<compile_context>
chip_gen: v6e
topology: v6e:2x2x1
jax: 0.10.0
libtpu: 0.0.40
codegen_flags: <defaults>
</compile_context>

<pallas_src>
import jax
import jax.numpy as jnp
from jax.experimental import pallas as pl
from jax.experimental.pallas import tpu as pltpu

IN_CHANNELS = 8
ANCHOR_NUM = 3
MID = 256          # fixed by the module (Conv2d(in_channels, 256, 1))
EPS = 1e-5         # nn.BatchNorm2d default eps


# ---------------------------------------------------------------------------
# Kernel 1: depthwise 5x5 conv, lane-dense layout, folded into 5 MXU matmuls.
#   xp_ref : (1, H+4, (W+4)*C) f32   -- one padded image, channel-minor lanes
#   t_ref  : (5, (W+4)*C, W*C) f32   -- banded shift-and-scale weights per dy
#   f_ref  : (1, H, W*C)       f32   -- conv output, lane-dense
# ---------------------------------------------------------------------------
def _dwconv_kernel(xp_ref, t_ref, f_ref):
    xp = xp_ref[0]                               # (H+4, (W+4)*C)
    H = f_ref.shape[1]
    acc = jnp.zeros((H, f_ref.shape[2]), jnp.float32)
    for dy in range(5):                          # dx taps are folded in T[dy]
        acc = acc + jnp.dot(xp[dy:dy + H, :], t_ref[dy],
                            preferred_element_type=jnp.float32)
    f_ref[0] = acc


# ---------------------------------------------------------------------------
# Kernel 2 (gridded over M, "parallel"): per tile of tokens
#   z = f @ a1 + bias1      (BN1 already folded into a1/bias1, bf16 MXU)
#   h = relu(z * s2 + t2)   (BN2 scale/shift precomputed from exact stats)
#   heads = h @ wh + bh     (merged cls+reg, lane-dense 128-wide, bf16 MXU)
# ---------------------------------------------------------------------------
def _rpn_apply_kernel(f_ref, a1_ref, bias1_ref, s2_ref, t2_ref, wh_ref, bh_ref,
                      h_ref, heads_ref):
    z = jnp.dot(f_ref[...].astype(jnp.bfloat16), a1_ref[...],
                preferred_element_type=jnp.float32) + bias1_ref[...]
    h = jnp.maximum(z * s2_ref[...] + t2_ref[...], 0.0)
    h_ref[...] = h
    heads_ref[...] = jnp.dot(h.astype(jnp.bfloat16), wh_ref[...],
                             preferred_element_type=jnp.float32) + bh_ref[...]


# ---------------------------------------------------------------------------
# Wrapper helpers
# ---------------------------------------------------------------------------
def _vmem_limit_bytes():
    # ~96 MiB on 128-MiB chips (v5e/v6e), ~48 MiB on v7x (64 MiB physical).
    try:
        cap = int(pltpu.get_tpu_info().vmem_capacity_bytes)
        return int(min(100 * 1024 * 1024, (cap * 3) // 4))
    except Exception:
        return 64 * 1024 * 1024


def _pick_tile(m):
    for t in (2048, 1024, 512, 256, 128, 64, 32, 16, 8):
        if m % t == 0 and m // t >= 2:
            return t
    return m


def _shift_matmul_weights(w_dw, W, C):
    """Banded (W+4)*C x W*C matrices folding the 5 dx taps of each dy row.

    T[dy][(w+dx)*C + c, w*C + c] = w_dw[dy, dx, c]; all other entries zero.
    """
    WpC, WC = (W + 4) * C, W * C
    mats = []
    for dy in range(5):
        t = jnp.zeros((WpC, WC), jnp.float32)
        for dx in range(5):
            scale = jnp.tile(w_dw[dy, dx], W)                       # (W*C,)
            t = t + jnp.eye(WpC, WC, k=-dx * C, dtype=jnp.float32) * scale[None, :]
        mats.append(t)
    return jnp.stack(mats)                                          # (5,WpC,WC)


def rpn_forward(x_nchw, params):
    N, C, H, W = x_nchw.shape
    Hp, Wp = H + 4, W + 4
    M = N * H * W
    WC, WpC = W * C, Wp * C
    a2 = params["wc"].shape[1]               # 2 * anchor_num
    a4 = params["wr"].shape[1]               # 4 * anchor_num
    head_w = a2 + a4
    head_pad = max(128, ((head_w + 127) // 128) * 128)
    vmem_limit = _vmem_limit_bytes()

    # ---- lane-dense input layout: (N, H+4, (W+4)*C) -------------------------
    x_nhwc = jnp.transpose(x_nchw, (0, 2, 3, 1))
    xpad = jnp.pad(x_nhwc, ((0, 0), (2, 2), (2, 2), (0, 0)))
    xpad_ld = xpad.reshape(N, Hp, WpC)
    tmats = _shift_matmul_weights(params["w_dw"], W, C)

    # ---- call 1: depthwise 5x5 conv on the MXU, grid over images ------------
    f_ld = pl.pallas_call(
        _dwconv_kernel,
        out_shape=jax.ShapeDtypeStruct((N, H, WC), jnp.float32),
        grid=(N,),
        in_specs=[pl.BlockSpec((1, Hp, WpC), lambda n: (n, 0, 0)),
                  pl.BlockSpec((5, WpC, WC), lambda n: (0, 0, 0))],
        out_specs=pl.BlockSpec((1, H, WC), lambda n: (n, 0, 0)),
        compiler_params=pltpu.CompilerParams(
            dimension_semantics=("parallel",),
            vmem_limit_bytes=vmem_limit),
    )(xpad_ld, tmats)

    # Token-major view of f: identical row-major HBM layout, so this reshape
    # is a reinterpretation, not a relayout of the heavy (M,256) tensors.
    f = f_ld.reshape(M, C)

    # ---- phase-1 statistics (tiny (M,8) reduction, exact two-phase BN) ------
    mu1 = jnp.mean(f, axis=0)                                        # (C,)
    fc = f - mu1[None, :]
    cov = jnp.matmul(fc.T, fc, precision=jax.lax.Precision.HIGHEST) / M
    var1 = jnp.maximum(jnp.diag(cov), 0.0)
    s1 = params["g1"] * jax.lax.rsqrt(var1 + EPS)                    # (C,)
    a1 = s1[:, None] * params["w1"]                                  # (C, MID)
    bias1 = (params["b1"] - mu1 * s1) @ params["w1"]                 # (MID,)
    # z = f @ a1 + bias1 is affine in f => BN2 batch stats follow exactly from
    # f's mean/covariance; the (M,256) z is never formed for statistics.
    mu2 = mu1 @ a1 + bias1                                           # (MID,)
    var2 = jnp.maximum(jnp.sum(a1 * (cov @ a1), axis=0), 0.0)        # (MID,)
    s2 = params["g2"] * jax.lax.rsqrt(var2 + EPS)
    t2 = params["b2"] - mu2 * s2

    # ---- merged cls+reg head weights, zero-padded to a lane-dense 128 -------
    wh = jnp.concatenate([params["wc"], params["wr"]], axis=1)       # (MID,18)
    wh = jnp.pad(wh, ((0, 0), (0, head_pad - head_w)))
    bh = jnp.concatenate([params["bc"], params["br"]])[None, :]
    bh = jnp.pad(bh, ((0, 0), (0, head_pad - head_w)))

    # ---- call 2: apply pass, gridded over M (parallel => dual-TC on v7x) ----
    tm = _pick_tile(M)
    h, heads = pl.pallas_call(
        _rpn_apply_kernel,
        out_shape=(jax.ShapeDtypeStruct((M, MID), jnp.float32),
                   jax.ShapeDtypeStruct((M, head_pad), jnp.float32)),
        grid=(M // tm,),
        in_specs=[pl.BlockSpec((tm, C), lambda i: (i, 0)),
                  pl.BlockSpec((C, MID), lambda i: (0, 0)),
                  pl.BlockSpec((1, MID), lambda i: (0, 0)),
                  pl.BlockSpec((1, MID), lambda i: (0, 0)),
                  pl.BlockSpec((1, MID), lambda i: (0, 0)),
                  pl.BlockSpec((MID, head_pad), lambda i: (0, 0)),
                  pl.BlockSpec((1, head_pad), lambda i: (0, 0))],
        out_specs=(pl.BlockSpec((tm, MID), lambda i: (i, 0)),
                   pl.BlockSpec((tm, head_pad), lambda i: (i, 0))),
        compiler_params=pltpu.CompilerParams(
            dimension_semantics=("parallel",),
            vmem_limit_bytes=vmem_limit),
    )(f, a1.astype(jnp.bfloat16), bias1[None, :], s2[None, :], t2[None, :],
      wh.astype(jnp.bfloat16), bh)

    # ---- back to the module's NCHW interface --------------------------------
    x_out = jnp.transpose(h.reshape(N, H, W, MID), (0, 3, 1, 2))
    cls_out = jnp.transpose(heads[:, :a2].reshape(N, H, W, a2), (0, 3, 1, 2))
    reg_out = jnp.transpose(heads[:, a2:head_w].reshape(N, H, W, a4),
                            (0, 3, 1, 2))
    return x_out, cls_out, reg_out


# ---------------------------------------------------------------------------
# Pure-JAX reference (mirrors the PyTorch module's forward, training-mode BN)
# ---------------------------------------------------------------------------
def rpn_reference(x_nchw, params):
    w_oihw = jnp.transpose(params["w_dw"], (2, 0, 1))[:, None, :, :]  # (C,1,5,5)
    dw = jax.lax.conv_general_dilated(
        x_nchw, w_oihw, window_strides=(1, 1), padding=((2, 2), (2, 2)),
        feature_group_count=IN_CHANNELS,
        dimension_numbers=("NCHW", "OIHW", "NCHW"))

    def bn(t, g, b):
        mu = t.mean(axis=(0, 2, 3), keepdims=True)
        var = ((t - mu) ** 2).mean(axis=(0, 2, 3), keepdims=True)
        return ((t - mu) / jnp.sqrt(var + EPS)) * g[None, :, None, None] \
            + b[None, :, None, None]

    y = bn(dw, params["g1"], params["b1"])
    z = jnp.einsum("nchw,co->nohw", y, params["w1"])
    h = jnp.maximum(bn(z, params["g2"], params["b2"]), 0.0)
    cls = jnp.einsum("nchw,co->nohw", h, params["wc"]) \
        + params["bc"][None, :, None, None]
    reg = jnp.einsum("nchw,co->nohw", h, params["wr"]) \
        + params["br"][None, :, None, None]
    return h, cls, reg


if __name__ == "__main__":
    key = jax.random.PRNGKey(0)
    ks = jax.random.split(key, 12)

    N, C, H, W = 2, IN_CHANNELS, 16, 16
    x = jax.random.normal(ks[0], (N, C, H, W), jnp.float32)

    params = {
        # dw_conv55[0]: Conv2d(C, C, 5, groups=C, bias=False) -> (5, 5, C)
        "w_dw": jax.random.normal(ks[1], (5, 5, C), jnp.float32) * 0.2,
        # dw_conv55[1]: BatchNorm2d(C)
        "g1": 1.0 + 0.1 * jax.random.normal(ks[2], (C,), jnp.float32),
        "b1": 0.1 * jax.random.normal(ks[3], (C,), jnp.float32),
        # dw_conv55[2]: Conv2d(C, 256, 1, bias=False) -> (C, 256)
        "w1": jax.random.normal(ks[4], (C, MID), jnp.float32) / (C ** 0.5),
        # dw_conv55[3]: BatchNorm2d(256)
        "g2": 1.0 + 0.1 * jax.random.normal(ks[5], (MID,), jnp.float32),
        "b2": 0.1 * jax.random.normal(ks[6], (MID,), jnp.float32),
        # rpn_cls: Conv2d(256, 2*A, 1, bias=True)
        "wc": jax.random.normal(ks[7], (MID, 2 * ANCHOR_NUM), jnp.float32) / 16.0,
        "bc": 0.1 * jax.random.normal(ks[8], (2 * ANCHOR_NUM,), jnp.float32),
        # rpn_reg: Conv2d(256, 4*A, 1, bias=True)
        "wr": jax.random.normal(ks[9], (MID, 4 * ANCHOR_NUM), jnp.float32) / 16.0,
        "br": 0.1 * jax.random.normal(ks[10], (4 * ANCHOR_NUM,), jnp.float32),
    }

    fwd = jax.jit(rpn_forward)
    outs = jax.block_until_ready(fwd(x, params))

    refs = rpn_reference(x, params)
    names = ("x", "rpn_cls", "rpn_reg")
    for o, r, name in zip(outs, refs, names):
        assert o.shape == r.shape, (name, o.shape, r.shape)
        if not jnp.allclose(o, r, rtol=2e-2, atol=2e-2):
            raise SystemExit(f"numerical mismatch in output '{name}'")

    print("KERNEL_OK")
</pallas_src>

<mosaic_0001>
module attributes {stable_mosaic.version = 11 : i64} {
  func.func @_dwconv_kernel(%arg0: i32, %arg1: memref<1x20x160xf32, #tpu.memory_space<vmem>>, %arg2: memref<5x160x128xf32, #tpu.memory_space<vmem>>, %arg3: memref<1x16x128xf32, #tpu.memory_space<vmem>>) attributes {dimension_semantics = [#tpu.dimension_semantics<parallel>], iteration_bounds = array<i64: 2>, scalar_prefetch = 0 : i64, scratch_operands = 0 : i64, tpu.core_type = #tpu.core_type<tc>, window_params = [{transform_indices = @transform_0, window_bounds = array<i64: 1, 20, 160>}, {pipeline_mode = #tpu.pipeline_mode<synchronous>, transform_indices = @transform_1, window_bounds = array<i64: 5, 160, 128>}, {transform_indices = @transform_2, window_bounds = array<i64: 1, 16, 128>}]} {
    %c0 = arith.constant 0 : index
    %c0_0 = arith.constant 0 : index
    %c0_1 = arith.constant 0 : index
    %0 = vector.load %arg1[%c0, %c0_0, %c0_1] : memref<1x20x160xf32, #tpu.memory_space<vmem>>, vector<1x20x160xf32>
    %1 = vector.shape_cast %0 : vector<1x20x160xf32> to vector<20x160xf32>
    %cst = arith.constant 0.000000e+00 : f32
    %2 = vector.broadcast %cst : f32 to vector<16x128xf32>
    %3 = vector.extract_strided_slice %1 {offsets = [0, 0], sizes = [16, 160], strides = [1, 1]} : vector<20x160xf32> to vector<16x160xf32>
    %c0_2 = arith.constant 0 : index
    %c0_3 = arith.constant 0 : index
    %c0_4 = arith.constant 0 : index
    %4 = vector.load %arg2[%c0_2, %c0_3, %c0_4] : memref<5x160x128xf32, #tpu.memory_space<vmem>>, vector<1x160x128xf32>
    %5 = vector.shape_cast %4 : vector<1x160x128xf32> to vector<160x128xf32>
    %cst_5 = arith.constant dense<0.000000e+00> : vector<16x128xf32>
    %6 = tpu.matmul %3, %5, %cst_5 {dimension_numbers = #tpu.dot_dimension_numbers<[1], [0], [0], [1], [0, 0, 1, 1], [], []>} : vector<16x160xf32>, vector<160x128xf32>, vector<16x128xf32> -> vector<16x128xf32>
    %7 = arith.addf %2, %6 : vector<16x128xf32>
    %8 = vector.extract_strided_slice %1 {offsets = [1, 0], sizes = [16, 160], strides = [1, 1]} : vector<20x160xf32> to vector<16x160xf32>
    %c1 = arith.constant 1 : index
    %c0_6 = arith.constant 0 : index
    %c0_7 = arith.constant 0 : index
    %9 = vector.load %arg2[%c1, %c0_6, %c0_7] : memref<5x160x128xf32, #tpu.memory_space<vmem>>, vector<1x160x128xf32>
    %10 = vector.shape_cast %9 : vector<1x160x128xf32> to vector<160x128xf32>
    %cst_8 = arith.constant dense<0.000000e+00> : vector<16x128xf32>
    %11 = tpu.matmul %8, %10, %cst_8 {dimension_numbers = #tpu.dot_dimension_numbers<[1], [0], [0], [1], [0, 0, 1, 1], [], []>} : vector<16x160xf32>, vector<160x128xf32>, vector<16x128xf32> -> vector<16x128xf32>
    %12 = arith.addf %7, %11 : vector<16x128xf32>
    %13 = vector.extract_strided_slice %1 {offsets = [2, 0], sizes = [16, 160], strides = [1, 1]} : vector<20x160xf32> to vector<16x160xf32>
    %c2 = arith.constant 2 : index
    %c0_9 = arith.constant 0 : index
    %c0_10 = arith.constant 0 : index
    %14 = vector.load %arg2[%c2, %c0_9, %c0_10] : memref<5x160x128xf32, #tpu.memory_space<vmem>>, vector<1x160x128xf32>
    %15 = vector.shape_cast %14 : vector<1x160x128xf32> to vector<160x128xf32>
    %cst_11 = arith.constant dense<0.000000e+00> : vector<16x128xf32>
    %16 = tpu.matmul %13, %15, %cst_11 {dimension_numbers = #tpu.dot_dimension_numbers<[1], [0], [0], [1], [0, 0, 1, 1], [], []>} : vector<16x160xf32>, vector<160x128xf32>, vector<16x128xf32> -> vector<16x128xf32>
    %17 = arith.addf %12, %16 : vector<16x128xf32>
    %18 = vector.extract_strided_slice %1 {offsets = [3, 0], sizes = [16, 160], strides = [1, 1]} : vector<20x160xf32> to vector<16x160xf32>
    %c3 = arith.constant 3 : index
    %c0_12 = arith.constant 0 : index
    %c0_13 = arith.constant 0 : index
    %19 = vector.load %arg2[%c3, %c0_12, %c0_13] : memref<5x160x128xf32, #tpu.memory_space<vmem>>, vector<1x160x128xf32>
    %20 = vector.shape_cast %19 : vector<1x160x128xf32> to vector<160x128xf32>
    %cst_14 = arith.constant dense<0.000000e+00> : vector<16x128xf32>
    %21 = tpu.matmul %18, %20, %cst_14 {dimension_numbers = #tpu.dot_dimension_numbers<[1], [0], [0], [1], [0, 0, 1, 1], [], []>} : vector<16x160xf32>, vector<160x128xf32>, vector<16x128xf32> -> vector<16x128xf32>
    %22 = arith.addf %17, %21 : vector<16x128xf32>
    %23 = vector.extract_strided_slice %1 {offsets = [4, 0], sizes = [16, 160], strides = [1, 1]} : vector<20x160xf32> to vector<16x160xf32>
    %c4 = arith.constant 4 : index
    %c0_15 = arith.constant 0 : index
    %c0_16 = arith.constant 0 : index
    %24 = vector.load %arg2[%c4, %c0_15, %c0_16] : memref<5x160x128xf32, #tpu.memory_space<vmem>>, vector<1x160x128xf32>
    %25 = vector.shape_cast %24 : vector<1x160x128xf32> to vector<160x128xf32>
    %cst_17 = arith.constant dense<0.000000e+00> : vector<16x128xf32>
    %26 = tpu.matmul %23, %25, %cst_17 {dimension_numbers = #tpu.dot_dimension_numbers<[1], [0], [0], [1], [0, 0, 1, 1], [], []>} : vector<16x160xf32>, vector<160x128xf32>, vector<16x128xf32> -> vector<16x128xf32>
    %27 = arith.addf %22, %26 : vector<16x128xf32>
    %c0_18 = arith.constant 0 : index
    %c0_19 = arith.constant 0 : index
    %c0_20 = arith.constant 0 : index
    %28 = vector.load %arg3[%c0_18, %c0_19, %c0_20] : memref<1x16x128xf32, #tpu.memory_space<vmem>>, vector<1x16x128xf32>
    %29 = vector.shape_cast %28 : vector<1x16x128xf32> to vector<16x128xf32>
    %30 = vector.shape_cast %27 : vector<16x128xf32> to vector<1x16x128xf32>
    tpu.vector_store %arg3[%c0_18, %c0_19, %c0_20], %30 {strides = array<i32>} : memref<1x16x128xf32, #tpu.memory_space<vmem>>, vector<1x16x128xf32>,
    return
  }
  func.func @transform_0(%arg0: i32) -> (i32, i32, i32) {
    %c0_i32 = arith.constant 0 : i32
    %c0_i32_0 = arith.constant 0 : i32
    %c0_i32_1 = arith.constant 0 : i32
    return %arg0, %c0_i32, %c0_i32_0 : i32, i32, i32
  }
  func.func @transform_1(%arg0: i32) -> (i32, i32, i32) {
    %c0_i32 = arith.constant 0 : i32
    %c0_i32_0 = arith.constant 0 : i32
    %c0_i32_1 = arith.constant 0 : i32
    %c0_i32_2 = arith.constant 0 : i32
    return %c0_i32, %c0_i32_0, %c0_i32_1 : i32, i32, i32
  }
  func.func @transform_2(%arg0: i32) -> (i32, i32, i32) {
    %c0_i32 = arith.constant 0 : i32
    %c0_i32_0 = arith.constant 0 : i32
    %c0_i32_1 = arith.constant 0 : i32
    return %arg0, %c0_i32, %c0_i32_0 : i32, i32, i32
  }
}

module attributes {stable_mosaic.version = 11 : i64} {
  func.func @_rpn_apply_kernel(%arg0: i32, %arg1: memref<256x8xf32, #tpu.memory_space<vmem>>, %arg2: memref<8x256xbf16, #tpu.memory_space<vmem>>, %arg3: memref<1x256xf32, #tpu.memory_space<vmem>>, %arg4: memref<1x256xf32, #tpu.memory_space<vmem>>, %arg5: memref<1x256xf32, #tpu.memory_space<vmem>>, %arg6: memref<256x128xbf16, #tpu.memory_space<vmem>>, %arg7: memref<1x128xf32, #tpu.memory_space<vmem>>, %arg8: memref<256x256xf32, #tpu.memory_space<vmem>>, %arg9: memref<256x128xf32, #tpu.memory_space<vmem>>) attributes {dimension_semantics = [#tpu.dimension_semantics<parallel>], iteration_bounds = array<i64: 2>, scalar_prefetch = 0 : i64, scratch_operands = 0 : i64, tpu.core_type = #tpu.core_type<tc>, window_params = [{transform_indices = @transform_0, window_bounds = array<i64: 256, 8>}, {pipeline_mode = #tpu.pipeline_mode<synchronous>, transform_indices = @transform_1, window_bounds = array<i64: 8, 256>}, {pipeline_mode = #tpu.pipeline_mode<synchronous>, transform_indices = @transform_2, window_bounds = array<i64: 1, 256>}, {pipeline_mode = #tpu.pipeline_mode<synchronous>, transform_indices = @transform_3, window_bounds = array<i64: 1, 256>}, {pipeline_mode = #tpu.pipeline_mode<synchronous>, transform_indices = @transform_4, window_bounds = array<i64: 1, 256>}, {pipeline_mode = #tpu.pipeline_mode<synchronous>, transform_indices = @transform_5, window_bounds = array<i64: 256, 128>}, {pipeline_mode = #tpu.pipeline_mode<synchronous>, transform_indices = @transform_6, window_bounds = array<i64: 1, 128>}, {transform_indices = @transform_7, window_bounds = array<i64: 256, 256>}, {transform_indices = @transform_8, window_bounds = array<i64: 256, 128>}]} {
    %c0 = arith.constant 0 : index
    %c0_0 = arith.constant 0 : index
    %0 = vector.load %arg1[%c0, %c0_0] : memref<256x8xf32, #tpu.memory_space<vmem>>, vector<256x8xf32>
    %1 = arith.truncf %0 : vector<256x8xf32> to vector<256x8xbf16>
    %c0_1 = arith.constant 0 : index
    %c0_2 = arith.constant 0 : index
    %2 = vector.load %arg2[%c0_1, %c0_2] : memref<8x256xbf16, #tpu.memory_space<vmem>>, vector<8x256xbf16>
    %cst = arith.constant dense<0.000000e+00> : vector<256x256xf32>
    %3 = tpu.matmul %1, %2, %cst {dimension_numbers = #tpu.dot_dimension_numbers<[1], [0], [0], [1], [0, 0, 1, 1], [], []>} : vector<256x8xbf16>, vector<8x256xbf16>, vector<256x256xf32> -> vector<256x256xf32>
    %c0_3 = arith.constant 0 : index
    %c0_4 = arith.constant 0 : index
    %4 = vector.load %arg3[%c0_3, %c0_4] : memref<1x256xf32, #tpu.memory_space<vmem>>, vector<1x256xf32>
    %5 = vector.broadcast %4 : vector<1x256xf32> to vector<256x256xf32>
    %6 = arith.addf %3, %5 : vector<256x256xf32>
    %c0_5 = arith.constant 0 : index
    %c0_6 = arith.constant 0 : index
    %7 = vector.load %arg4[%c0_5, %c0_6] : memref<1x256xf32, #tpu.memory_space<vmem>>, vector<1x256xf32>
    %8 = vector.broadcast %7 : vector<1x256xf32> to vector<256x256xf32>
    %9 = arith.mulf %6, %8 : vector<256x256xf32>
    %c0_7 = arith.constant 0 : index
    %c0_8 = arith.constant 0 : index
    %10 = vector.load %arg5[%c0_7, %c0_8] : memref<1x256xf32, #tpu.memory_space<vmem>>, vector<1x256xf32>
    %11 = vector.broadcast %10 : vector<1x256xf32> to vector<256x256xf32>
    %12 = arith.addf %9, %11 : vector<256x256xf32>
    %cst_9 = arith.constant 0.000000e+00 : f32
    %13 = vector.broadcast %cst_9 : f32 to vector<256x256xf32>
    %14 = arith.maximumf %12, %13 : vector<256x256xf32>
    %c0_10 = arith.constant 0 : index
    %c0_11 = arith.constant 0 : index
    %15 = vector.load %arg8[%c0_10, %c0_11] : memref<256x256xf32, #tpu.memory_space<vmem>>, vector<256x256xf32>
    tpu.vector_store %arg8[%c0_10, %c0_11], %14 {strides = array<i32>} : memref<256x256xf32, #tpu.memory_space<vmem>>, vector<256x256xf32>,
    %16 = arith.truncf %14 : vector<256x256xf32> to vector<256x256xbf16>
    %c0_12 = arith.constant 0 : index
    %c0_13 = arith.constant 0 : index
    %17 = vector.load %arg6[%c0_12, %c0_13] : memref<256x128xbf16, #tpu.memory_space<vmem>>, vector<256x128xbf16>
    %cst_14 = arith.constant dense<0.000000e+00> : vector<256x128xf32>
    %18 = tpu.matmul %16, %17, %cst_14 {dimension_numbers = #tpu.dot_dimension_numbers<[1], [0], [0], [1], [0, 0, 1, 1], [], []>} : vector<256x256xbf16>, vector<256x128xbf16>, vector<256x128xf32> -> vector<256x128xf32>
    %c0_15 = arith.constant 0 : index
    %c0_16 = arith.constant 0 : index
    %19 = vector.load %arg7[%c0_15, %c0_16] : memref<1x128xf32, #tpu.memory_space<vmem>>, vector<1x128xf32>
    %20 = vector.broadcast %19 : vector<1x128xf32> to vector<256x128xf32>
    %21 = arith.addf %18, %20 : vector<256x128xf32>
    %c0_17 = arith.constant 0 : index
    %c0_18 = arith.constant 0 : index
    %22 = vector.load %arg9[%c0_17, %c0_18] : memref<256x128xf32, #tpu.memory_space<vmem>>, vector<256x128xf32>
    tpu.vector_store %arg9[%c0_17, %c0_18], %21 {strides = array<i32>} : memref<256x128xf32, #tpu.memory_space<vmem>>, vector<256x128xf32>,
    return
  }
  func.func @transform_0(%arg0: i32) -> (i32, i32) {
    %c0_i32 = arith.constant 0 : i32
    %c0_i32_0 = arith.constant 0 : i32
    return %arg0, %c0_i32 : i32, i32
  }
  func.func @transform_1(%arg0: i32) -> (i32, i32) {
    %c0_i32 = arith.constant 0 : i32
    %c0_i32_0 = arith.constant 0 : i32
    %c0_i32_1 = arith.constant 0 : i32
    return %c0_i32, %c0_i32_0 : i32, i32
  }
  func.func @transform_2(%arg0: i32) -> (i32, i32) {
    %c0_i32 = arith.constant 0 : i32
    %c0_i32_0 = arith.constant 0 : i32
    %c0_i32_1 = arith.constant 0 : i32
    return %c0_i32, %c0_i32_0 : i32, i32
  }
  func.func @transform_3(%arg0: i32) -> (i32, i32) {
    %c0_i32 = arith.constant 0 : i32
    %c0_i32_0 = arith.constant 0 : i32
    %c0_i32_1 = arith.constant 0 : i32
    return %c0_i32, %c0_i32_0 : i32, i32
  }
  func.func @transform_4(%arg0: i32) -> (i32, i32) {
    %c0_i32 = arith.constant 0 : i32
    %c0_i32_0 = arith.constant 0 : i32
    %c0_i32_1 = arith.constant 0 : i32
    return %c0_i32, %c0_i32_0 : i32, i32
  }
  func.func @transform_5(%arg0: i32) -> (i32, i32) {
    %c0_i32 = arith.constant 0 : i32
    %c0_i32_0 = arith.constant 0 : i32
    %c0_i32_1 = arith.constant 0 : i32
    return %c0_i32, %c0_i32_0 : i32, i32
  }
  func.func @transform_6(%arg0: i32) -> (i32, i32) {
    %c0_i32 = arith.constant 0 : i32
    %c0_i32_0 = arith.constant 0 : i32
    %c0_i32_1 = arith.constant 0 : i32
    return %c0_i32, %c0_i32_0 : i32, i32
  }
  func.func @transform_7(%arg0: i32) -> (i32, i32) {
    %c0_i32 = arith.constant 0 : i32
    %c0_i32_0 = arith.constant 0 : i32
    return %arg0, %c0_i32 : i32, i32
  }
  func.func @transform_8(%arg0: i32) -> (i32, i32) {
    %c0_i32 = arith.constant 0 : i32
    %c0_i32_0 = arith.constant 0 : i32
    return %arg0, %c0_i32 : i32, i32
  }
}

</mosaic_0001>

<bundles_post_ra>
// kernel: tile.122
= control target key start
LH: loop header
LB: loop body
LE: loop exit
PB: predicated region body
PF: predicated region fallthrough
CT: control target
= control target key end

     0   :  { %s28_s0 = inlined_call_operand.vmem [shape: f32[8], index: 0, kind: input, shape index: {}]   ;;  %s29_s1 = inlined_call_operand.vmem [shape: f32[16,8], index: 1, kind: output, shape index: {}]  }
   0x1   :  { %v4_v0 = vld [vmem:[%s28_s0] ss:$0 sm:$0xff] }
   0x2   :  { %5 = vst [vmem:[%s29_s1] sm:$0xff] %v4_v0  ;;  %8 = vst [vmem:[%s29_s1 + $0x8] sm:$0xff] %v4_v0 }

// kernel: rpn_forward.2
= control target key start
LH: loop header
LB: loop body
LE: loop exit
PB: predicated region body
PF: predicated region fallthrough
CT: control target
= control target key end

     0   :  { %s946_s9 = smov 0   ;;  %s1483_s0 = inlined_call_operand.vmem [shape: f32[2,20,160], index: 0, kind: input, shape index: {}]   ;;  %s1484_s1 = inlined_call_operand.vmem [shape: f32[5,160,128], index: 1, kind: input, shape index: {}]   ;;  %s1485_s2 = inlined_call_operand.vmem [shape: f32[2,16,128], index: 2, kind: output, shape index: {}]  }
   0x1 LB: > { %s771_s10 = sadd.s32 4294967295, %s928_s9   ;;  %p775_p0 = scmp.ge.s32.totalorder %s928_s9, 1  ;;  %s928_s9 = sphi %s946_s9, %s12_s9  }
   0x2   : > { %p112_p1 = scmp.lt.s32.totalorder %s928_s9, 3 }
   0x4   : > { %p113_p2 = pnand %p775_p0, %p112_p1 }
   0x5   : > { %p134_p3 = scmp.lt.s32.totalorder (!%p113_p2), %s771_s10, 1 }
   0x6   : > { %116 = sbr.rel (%p113_p2) target bundleno = 337 (0x151), region = 28 }
   0xb   : > { %v794_v0 = vld [vmem:[%s1484_s1 + $0x118] sm:$0xff]  ;;  %v930_v2 = vmov 0.0   ;;  %v793_v3 = vld [vmem:[%s1484_s1 + $0x110] sm:$0xff]  ;;  %v792_v5 = vld [vmem:[%s1484_s1 + $0x108] sm:$0xff]  ;;  %s1487_s10 = smov (!%p134_p3, %s771_s10), 1  ;;  %vm620_vm0 = vcmask 1043456  }
   0xc   : > { %v165_v1 = vld [vmem:[%s1484_s1 + $0x78] sm:$0xff]  ;;  %215 = vmatprep.subr.mxu0 %v930_v2  ;;  %294 = vmatprep.subr.mxu1 %v930_v2  ;;  %v164_v4 = vld [vmem:[%s1484_s1 + $0x70] sm:$0xff]  ;;  %v163_v6 = vld [vmem:[%s1484_s1 + $0x68] sm:$0xff]  ;;  %s912_s7 = smul.u32 48, %s1487_s10  ;;  %vm197_vm1 = vcmask 1046528   ;;  %vm210_vm2 = vcmask 261120  }
   0xd   : > { %216 = vmatpush1.msra.mxu0 %v794_v0  ;;  %295 = vmatpush1.msra.mxu1 %v165_v1  ;;  %v791_v7 = vld [vmem:[%s1484_s1 + $0x100] sm:$0xff]  ;;  %v790_v9 = vld [vmem:[%s1484_s1 + $0xf8] sm:$0xff]  ;;  %v789_v11 = vld [vmem:[%s1484_s1 + $0xf0] sm:$0xff]  ;;  %vm390_vm3 = vcmask 1045504   ;;  %vm505_vm4 = vcmask 1044480   ;;  %s871_s8 = sshll.u32 %s1487_s10, 4 }
   0xe   : > { %217 = vmatprep.subr.mxu0 %v930_v2  ;;  %296 = vmatprep.subr.mxu1 %v930_v2  ;;  %v162_v8 = vld [vmem:[%s1484_s1 + $0x60] sm:$0xff]  ;;  %v161_v10 = vld [vmem:[%s1484_s1 + $0x58] sm:$0xff]  ;;  %v160_v12 = vld [vmem:[%s1484_s1 + $0x50] sm:$0xff]  ;;  %s1022_s20 = scalar_lea.vmem %s1483_s0, %s912_s7  ;;  %s143_s13 = scalar_lea.vmem %s1485_s2, %s871_s8 }
   0xf   : > { %218 = vmatpush1.msra.mxu0 %v793_v3  ;;  %297 = vmatpush1.msra.mxu1 %v164_v4  ;;  %v788_v13 = vld [vmem:[%s1484_s1 + $0xe8] sm:$0xff]  ;;  %v787_v15 = vld [vmem:[%s1484_s1 + $0xe0] sm:$0xff]  ;;  %v786_v17 = vld [vmem:[%s1484_s1 + $0xd8] sm:$0xff] }
  0x10   : > { %219 = vmatprep.subr.mxu0 %v930_v2  ;;  %298 = vmatprep.subr.mxu1 %v930_v2  ;;  %v159_v14 = vld [vmem:[%s1484_s1 + $0x48] sm:$0xff]  ;;  %v158_v16 = vld [vmem:[%s1484_s1 + $0x40] sm:$0xff]  ;;  %v157_v18 = vld [vmem:[%s1484_s1 + $0x38] sm:$0xff] }
  0x11   : > { %220 = vmatpush1.msra.mxu0 %v792_v5  ;;  %299 = vmatpush1.msra.mxu1 %v163_v6  ;;  %v785_v19 = vld [vmem:[%s1484_s1 + $0xd0] sm:$0xff]  ;;  %v1041_v21 = vld [vmem:[%s1022_s20 + $0x8] sm:$0xff]  ;;  %v1044_v22 = vld [vmem:[%s1022_s20 + $0x18] sm:$0xff] }
  0x12   : > { %221 = vmatprep.subr.mxu0 %v930_v2  ;;  %300 = vmatprep.subr.mxu1 %v930_v2  ;;  %v156_v20 = vld [vmem:[%s1484_s1 + $0x30] sm:$0xff]  ;;  %v1047_v23 = vld [vmem:[%s1022_s20] sm:$0xff]  ;;  %v624_v25 = vrot.slane %v1041_v21, 4  ;;  %v625_v26 = vrot.slane %v1044_v22, 4  ;;  %v784_v27 = vld [vmem:[%s1484_s1 + $0xc8] sm:$0xff]  ;;  %v201_v47 = vrot.slane %v1041_v21, 1 }
  0x13   : > { %222 = vmatpush1.msra.mxu0 %v791_v7  ;;  %301 = vmatpush1.msra.mxu1 %v162_v8  ;;  %v1050_v24 = vld [vmem:[%s1022_s20 + $0x10] sm:$0xff]  ;;  %v155_v28 = vld [vmem:[%s1484_s1 + $0x28] sm:$0xff]  ;;  %v621_v29 = vrot.slane %v1047_v23, 4  ;;  %v783_v32 = vld [vmem:[%s1484_s1 + $0xc0] sm:$0xff]  ;;  %v202_v48 = vrot.slane %v1044_v22, 1  ;;  %v198_v51 = vrot.slane %v1047_v23, 1 }
  0x14   : > { %223 = vmatprep.subr.mxu0 %v930_v2  ;;  %302 = vmatprep.subr.mxu1 %v930_v2  ;;  %v622_v30 = vrot.slane %v1050_v24, 4  ;;  %v1067_v31 = vsel %vm620_vm0, %v624_v25, %v625_v26  ;;  %v154_v33 = vld [vmem:[%s1484_s1 + $0x20] sm:$0xff]  ;;  %v782_v35 = vld [vmem:[%s1484_s1 + $0xb8] sm:$0xff]  ;;  %v781_v37 = vld [vmem:[%s1484_s1 + $0xb0] sm:$0xff]  ;;  %v199_v52 = vrot.slane %v1050_v24, 1 }
  0x15   : > { %224 = vmatpush1.msra.mxu0 %v790_v9  ;;  %303 = vmatpush1.msra.mxu1 %v161_v10  ;;  %v153_v36 = vld [vmem:[%s1484_s1 + $0x18] sm:$0xff]  ;;  %v152_v38 = vld [vmem:[%s1484_s1 + $0x10] sm:$0xff]  ;;  %v780_v39 = vld [vmem:[%s1484_s1 + $0xa8] sm:$0xff]  ;;  %v203_v54 = vsel %vm197_vm1, %v201_v47, %v202_v48  ;;  %v510_v47 = vrot.slane %v1044_v22, 3 }
  0x16   : > { %225 = vmatprep.subr.mxu0 %v930_v2  ;;  %304 = vmatprep.subr.mxu1 %v930_v2  ;;  %v1080_v34 = vsel %vm620_vm0, %v621_v29, %v622_v30  ;;  %v151_v40 = vld [vmem:[%s1484_s1 + $0x8] sm:$0xff]  ;;  %v779_v41 = vld [vmem:[%s1484_s1 + $0xa0] sm:$0xff]  ;;  %v798_v43 = vld [vmem:[%s1484_s1 + $0x138] sm:$0xff]  ;;  %v200_v56 = vsel %vm197_vm1, %v198_v51, %v199_v52  ;;  %v392_v51 = vrot.slane %v1050_v24, 2 }
  0x17   : > { %226 = vmatpush1.msra.mxu0 %v789_v11  ;;  %305 = vmatpush1.msra.mxu1 %v160_v12  ;;  %v150_v42 = vld [vmem:[%s1484_s1] sm:$0xff]  ;;  %v169_v44 = vld [vmem:[%s1484_s1 + $0x98] sm:$0xff]  ;;  %v797_v45 = vld [vmem:[%s1484_s1 + $0x130] sm:$0xff] }
  0x18   : > { %227 = vmatprep.subr.mxu0 %v930_v2  ;;  %306 = vmatprep.subr.mxu1 %v930_v2  ;;  %v168_v46 = vld [vmem:[%s1484_s1 + $0x90] sm:$0xff]  ;;  %v796_v49 = vld [vmem:[%s1484_s1 + $0x128] sm:$0xff]  ;;  %v795_v53 = vld [vmem:[%s1484_s1 + $0x120] sm:$0xff] }
  0x19   : > { %228 = vmatpush1.msra.mxu0 %v788_v13  ;;  %307 = vmatpush1.msra.mxu1 %v159_v14  ;;  %v167_v50 = vld [vmem:[%s1484_s1 + $0x88] sm:$0xff]  ;;  %v166_v55 = vld [vmem:[%s1484_s1 + $0x80] sm:$0xff]  ;;  %v818_v57 = vld [vmem:[%s1484_s1 + $0x1b8] sm:$0xff] }
  0x1a   : > { %229 = vmatprep.subr.mxu0 %v930_v2  ;;  %308 = vmatprep.subr.mxu1 %v930_v2  ;;  %v840_v58 = vld [vmem:[%s1484_s1 + $0x258] sm:$0xff]  ;;  %v817_v59 = vld [vmem:[%s1484_s1 + $0x1b0] sm:$0xff]  ;;  %v816_v61 = vld [vmem:[%s1484_s1 + $0x1a8] sm:$0xff] }
  0x1b   : > { %230 = vmatpush1.msra.mxu0 %v787_v15  ;;  %309 = vmatpush1.msra.mxu1 %v158_v16  ;;  %v839_v60 = vld [vmem:[%s1484_s1 + $0x250] sm:$0xff]  ;;  %v838_v62 = vld [vmem:[%s1484_s1 + $0x248] sm:$0xff]  ;;  %v815_v63 = vld [vmem:[%s1484_s1 + $0x1a0] sm:$0xff] }
  0x1c   : > { %231 = vmatprep.subr.mxu0 %v930_v2  ;;  %310 = vmatprep.subr.mxu1 %v930_v2  ;;  %v837_v0 = vld [vmem:[%s1484_s1 + $0x240] sm:$0xff]  ;;  %v814_v1 = vld [vmem:[%s1484_s1 + $0x198] sm:$0xff]  ;;  %v813_v4 = vld [vmem:[%s1484_s1 + $0x190] sm:$0xff] }
  0x1d   : > { %232 = vmatpush1.msra.mxu0 %v786_v17  ;;  %311 = vmatpush1.msra.mxu1 %v157_v18  ;;  %v836_v3 = vld [vmem:[%s1484_s1 + $0x238] sm:$0xff]  ;;  %v835_v5 = vld [vmem:[%s1484_s1 + $0x230] sm:$0xff]  ;;  %v812_v6 = vld [vmem:[%s1484_s1 + $0x188] sm:$0xff] }
  0x1e   : > { %233 = vmatprep.subr.mxu0 %v930_v2  ;;  %312 = vmatprep.subr.mxu1 %v930_v2  ;;  %v834_v7 = vld [vmem:[%s1484_s1 + $0x228] sm:$0xff]  ;;  %v811_v8 = vld [vmem:[%s1484_s1 + $0x180] sm:$0xff]  ;;  %v810_v10 = vld [vmem:[%s1484_s1 + $0x178] sm:$0xff] }
  0x1f   : > { %234 = vmatpush1.msra.mxu0 %v785_v19  ;;  %313 = vmatpush1.msra.mxu1 %v156_v20  ;;  %v833_v9 = vld [vmem:[%s1484_s1 + $0x220] sm:$0xff]  ;;  %v832_v11 = vld [vmem:[%s1484_s1 + $0x218] sm:$0xff]  ;;  %v809_v12 = vld [vmem:[%s1484_s1 + $0x170] sm:$0xff] }
  0x20   : > { %235 = vmatprep.subr.mxu0 %v930_v2  ;;  %314 = vmatprep.subr.mxu1 %v930_v2  ;;  %v831_v13 = vld [vmem:[%s1484_s1 + $0x210] sm:$0xff]  ;;  %v808_v14 = vld [vmem:[%s1484_s1 + $0x168] sm:$0xff]  ;;  %v807_v16 = vld [vmem:[%s1484_s1 + $0x160] sm:$0xff] }
  0x21   : > { %236 = vmatpush1.msra.mxu0 %v784_v27  ;;  %315 = vmatpush1.msra.mxu1 %v155_v28  ;;  %v830_v15 = vld [vmem:[%s1484_s1 + $0x208] sm:$0xff]  ;;  %v829_v17 = vld [vmem:[%s1484_s1 + $0x200] sm:$0xff]  ;;  %v806_v18 = vld [vmem:[%s1484_s1 + $0x158] sm:$0xff] }
  0x22   : > { %237 = vmatprep.subr.mxu0 %v930_v2  ;;  %316 = vmatprep.subr.mxu1 %v930_v2  ;;  %v828_v19 = vld [vmem:[%s1484_s1 + $0x1f8] sm:$0xff]  ;;  %v805_v20 = vld [vmem:[%s1484_s1 + $0x150] sm:$0xff]  ;;  %v1273_v27 = vld [vmem:[%s1022_s20 + $0x28] sm:$0xf] }
  0x23   : > { %238 = vmatpush1.msra.mxu0 %v783_v32  ;;  %317 = vmatpush1.msra.mxu1 %v154_v33  ;;  %v827_v25 = vld [vmem:[%s1484_s1 + $0x1f0] sm:$0xff]  ;;  %v804_v28 = vld [vmem:[%s1484_s1 + $0x148] sm:$0xff]  ;;  %v1284_v32 = vld [vmem:[%s1022_s20 + $0x20] sm:$0xf]  ;;  %v206_v33 = vrot.slane %v1273_v27, 1 }
  0x24   : > { %239 = vmatprep.subr.mxu0 %v930_v2  ;;  %318 = vmatprep.subr.mxu1 %v930_v2  ;;  %v826_v29 = vld [vmem:[%s1484_s1 + $0x1e8] sm:$0xff] }
  0x25   : > { %240 = vmatpush1.msra.mxu0 %v782_v35  ;;  %319 = vmatpush1.msra.mxu1 %v153_v36  ;;  %v803_v35 = vld [vmem:[%s1484_s1 + $0x140] sm:$0xff] }
  0x26   : > { %241 = vmatprep.subr.mxu0 %v930_v2  ;;  %320 = vmatprep.subr.mxu1 %v930_v2  ;;  %v825_v36 = vld [vmem:[%s1484_s1 + $0x1e0] sm:$0xff] }
  0x27   : > { %242 = vmatpush1.msra.mxu0 %v781_v37  ;;  %321 = vmatpush1.msra.mxu1 %v152_v38  ;;  %v204_v37 = vrot.slane %v1284_v32, 1  ;;  %v822_v38 = vld [vmem:[%s1484_s1 + $0x1d8] sm:$0xff] }
  0x28   : > { %243 = vmatprep.subr.mxu0 %v930_v2  ;;  %322 = vmatprep.subr.mxu1 %v930_v2 }
  0x29   : > { %244 = vmatpush1.msra.mxu0 %v780_v39  ;;  %323 = vmatpush1.msra.mxu1 %v151_v40  ;;  %v844_v39 = vld [vmem:[%s1484_s1 + $0x278] sm:$0xff]  ;;  %v207_v40 = vsel %vm197_vm1, %v202_v48, %v206_v33  ;;  %v820_v48 = vld [vmem:[%s1484_s1 + $0x1c8] sm:$0xff] }
  0x2a   : > { %245 = vmatprep.subr.mxu0 %v930_v2  ;;  %324 = vmatprep.subr.mxu1 %v930_v2 }
  0x2b   : > { %246 = vmatpush1.msra.mxu0 %v779_v41  ;;  %325 = vmatpush1.msra.mxu1 %v150_v42  ;;  %v205_v41 = vsel %vm197_vm1, %v199_v52, %v204_v37  ;;  %v821_v42 = vld [vmem:[%s1484_s1 + $0x1d0] sm:$0xff]  ;;  %v506_v52 = vrot.slane %v1047_v23, 3 }
  0x2c   : > { %271 = vmatprep.subr.mxu0 %v930_v2  ;;  %350 = vmatprep.subr.mxu1 %v930_v2 }
  0x2d   : > { %272 = vmatpush2.msra.mxu0 %v798_v43  ;;  %351 = vmatpush2.msra.mxu1 %v169_v44  ;;  %v843_v43 = vld [vmem:[%s1484_s1 + $0x270] sm:$0xff]  ;;  %v394_v44 = vrot.slane %v1041_v21, 2 }
  0x2e   : > { %273 = vmatprep.subr.mxu0 %v930_v2  ;;  %352 = vmatprep.subr.mxu1 %v930_v2 }
  0x2f   : > { %274 = vmatpush2.msra.mxu0 %v797_v45  ;;  %353 = vmatpush2.msra.mxu1 %v168_v46  ;;  %v395_v45 = vrot.slane %v1044_v22, 2  ;;  %v509_v46 = vrot.slane %v1041_v21, 3 }
  0x30   : > { %275 = vmatprep.subr.mxu0 %v930_v2  ;;  %354 = vmatprep.subr.mxu1 %v930_v2 }
  0x31   : > { %276 = vmatpush2.msra.mxu0 %v796_v49  ;;  %355 = vmatpush2.msra.mxu1 %v167_v50  ;;  %v842_v49 = vld [vmem:[%s1484_s1 + $0x268] sm:$0xff]  ;;  %v391_v50 = vrot.slane %v1047_v23, 2 }
  0x32   : > { %277 = vmatprep.subr.mxu0 %v930_v2  ;;  %356 = vmatprep.subr.mxu1 %v930_v2 }
  0x33   : > { %278 = vmatpush2.msra.mxu0 %v795_v53  ;;  %799 = vmatprep.mubr.msk.f32.mxu0 %vm210_vm2, %v203_v54  ;;  %v819_v53 = vld [vmem:[%s1484_s1 + $0x1c0] sm:$0xff]  ;;  %v396_v54 = vsel %vm390_vm3, %v394_v44, %v395_v45 }
  0x34   : > { %357 = vmatpush2.msra.mxu1 %v166_v55  ;;  %801 = vmatprep.mubr.msk.f32.mxu1 %vm210_vm2, %v1041_v21  ;;  %v507_v21 = vrot.slane %v1050_v24, 3  ;;  %v511_v55 = vsel %vm505_vm4, %v509_v46, %v510_v47 }
  0x35   : > { %280 = vmatmul.mubr.f32.vlgmr.msra.gmra.mxu0 %v200_v56  ;;  %359 = vmatmul.mubr.f32.vlgmr.msra.gmra.mxu1 %v1047_v23  ;;  %v841_v23 = vld [vmem:[%s1484_s1 + $0x260] sm:$0xff]  ;;  %v393_v56 = vsel %vm390_vm3, %v391_v50, %v392_v51 }
  0x36   : > { %407 = vmatprep.subr.mxu0 %v930_v2  ;;  %522 = vmatprep.subr.mxu1 %v930_v2 }
  0x37   : > { %408 = vmatpush1.msra.mxu0 %v818_v57  ;;  %523 = vmatpush1.msra.mxu1 %v840_v58  ;;  %v508_v57 = vsel %vm505_vm4, %v506_v52, %v507_v21  ;;  %v399_v58 = vrot.slane %v1273_v27, 2 }
  0x38   : > { %409 = vmatprep.subr.mxu0 %v930_v2  ;;  %524 = vmatprep.subr.mxu1 %v930_v2 }
  0x39   : > { %410 = vmatpush1.msra.mxu0 %v817_v59  ;;  %525 = vmatpush1.msra.mxu1 %v839_v60  ;;  %v397_v59 = vrot.slane %v1284_v32, 2  ;;  %v862_v60 = vld [vmem:[%s1484_s1 + $0x2f8] sm:$0xff] }
  0x3a   : > { %411 = vmatprep.subr.mxu0 %v930_v2  ;;  %526 = vmatprep.subr.mxu1 %v930_v2 }
  0x3b   : > { %412 = vmatpush1.msra.mxu0 %v816_v61  ;;  %527 = vmatpush1.msra.mxu1 %v838_v62  ;;  %v514_v61 = vrot.slane %v1273_v27, 3  ;;  %v400_v62 = vsel %vm390_vm3, %v395_v45, %v399_v58 }
  0x3c   : > { %413 = vmatprep.subr.mxu0 %v930_v2  ;;  %528 = vmatprep.subr.mxu1 %v930_v2 }
  0x3d   : > { %414 = vmatpush1.msra.mxu0 %v815_v63  ;;  %529 = vmatpush1.msra.mxu1 %v837_v0  ;;  %v861_v63 = vld [vmem:[%s1484_s1 + $0x2f0] sm:$0xff]  ;;  %v398_v0 = vsel %vm390_vm3, %v392_v51, %v397_v59 }
  0x3e   : > { %415 = vmatprep.subr.mxu0 %v930_v2  ;;  %530 = vmatprep.subr.mxu1 %v930_v2 }
  0x3f   : > { %416 = vmatpush1.msra.mxu0 %v814_v1  ;;  %531 = vmatpush1.msra.mxu1 %v836_v3  ;;  %v512_v1 = vrot.slane %v1284_v32, 3  ;;  %v515_v3 = vsel %vm505_vm4, %v510_v47, %v514_v61 }
  0x40   : > { %417 = vmatprep.subr.mxu0 %v930_v2  ;;  %532 = vmatprep.subr.mxu1 %v930_v2 }
  0x41   : > { %418 = vmatpush1.msra.mxu0 %v813_v4  ;;  %533 = vmatpush1.msra.mxu1 %v835_v5  ;;  %v860_v4 = vld [vmem:[%s1484_s1 + $0x2e8] sm:$0xff]  ;;  %v513_v5 = vsel %vm505_vm4, %v507_v21, %v512_v1 }
  0x42   : > { %419 = vmatprep.subr.mxu0 %v930_v2  ;;  %534 = vmatprep.subr.mxu1 %v930_v2 }
  0x43   : > { %420 = vmatpush1.msra.mxu0 %v812_v6  ;;  %535 = vmatpush1.msra.mxu1 %v834_v7  ;;  %v859_v6 = vld [vmem:[%s1484_s1 + $0x2e0] sm:$0xff]  ;;  %v858_v7 = vld [vmem:[%s1484_s1 + $0x2d8] sm:$0xff] }
  0x44   : > { %421 = vmatprep.subr.mxu0 %v930_v2  ;;  %536 = vmatprep.subr.mxu1 %v930_v2 }
  0x45   : > { %422 = vmatpush1.msra.mxu0 %v811_v8  ;;  %537 = vmatpush1.msra.mxu1 %v833_v9  ;;  %v857_v8 = vld [vmem:[%s1484_s1 + $0x2d0] sm:$0xff]  ;;  %v856_v9 = vld [vmem:[%s1484_s1 + $0x2c8] sm:$0xff] }
  0x46   : > { %423 = vmatprep.subr.mxu0 %v930_v2  ;;  %538 = vmatprep.subr.mxu1 %v930_v2 }
  0x47   : > { %424 = vmatpush1.msra.mxu0 %v810_v10  ;;  %539 = vmatpush1.msra.mxu1 %v832_v11  ;;  %v855_v10 = vld [vmem:[%s1484_s1 + $0x2c0] sm:$0xff]  ;;  %v854_v11 = vld [vmem:[%s1484_s1 + $0x2b8] sm:$0xff] }
  0x48   : > { %425 = vmatprep.subr.mxu0 %v930_v2  ;;  %540 = vmatprep.subr.mxu1 %v930_v2 }
  0x49   : > { %426 = vmatpush1.msra.mxu0 %v809_v12  ;;  %541 = vmatpush1.msra.mxu1 %v831_v13  ;;  %v853_v12 = vld [vmem:[%s1484_s1 + $0x2b0] sm:$0xff]  ;;  %v852_v13 = vld [vmem:[%s1484_s1 + $0x2a8] sm:$0xff] }
  0x4a   : > { %427 = vmatprep.subr.mxu0 %v930_v2  ;;  %542 = vmatprep.subr.mxu1 %v930_v2 }
  0x4b   : > { %428 = vmatpush1.msra.mxu0 %v808_v14  ;;  %543 = vmatpush1.msra.mxu1 %v830_v15  ;;  %v851_v14 = vld [vmem:[%s1484_s1 + $0x2a0] sm:$0xff]  ;;  %v850_v15 = vld [vmem:[%s1484_s1 + $0x298] sm:$0xff] }
  0x4c   : > { %429 = vmatprep.subr.mxu0 %v930_v2  ;;  %544 = vmatprep.subr.mxu1 %v930_v2 }
  0x4d   : > { %430 = vmatpush1.msra.mxu0 %v807_v16  ;;  %545 = vmatpush1.msra.mxu1 %v829_v17  ;;  %v849_v16 = vld [vmem:[%s1484_s1 + $0x290] sm:$0xff]  ;;  %v848_v17 = vld [vmem:[%s1484_s1 + $0x288] sm:$0xff] }
  0x4e   : > { %431 = vmatprep.subr.mxu0 %v930_v2  ;;  %546 = vmatprep.subr.mxu1 %v930_v2 }
  0x4f   : > { %432 = vmatpush1.msra.mxu0 %v806_v18  ;;  %547 = vmatpush1.msra.mxu1 %v828_v19  ;;  %v847_v18 = vld [vmem:[%s1484_s1 + $0x280] sm:$0xff]  ;;  %v866_v19 = vld [vmem:[%s1484_s1 + $0x318] sm:$0xff] }
  0x50   : > { %433 = vmatprep.subr.mxu0 %v930_v2  ;;  %548 = vmatprep.subr.mxu1 %v930_v2 }
  0x51   : > { %434 = vmatpush1.msra.mxu0 %v805_v20  ;;  %549 = vmatpush1.msra.mxu1 %v827_v25  ;;  %v865_v20 = vld [vmem:[%s1484_s1 + $0x310] sm:$0xff]  ;;  %v629_v25 = vrot.slane %v1273_v27, 4  ;;  %v863_v27 = vld [vmem:[%s1484_s1 + $0x300] sm:$0xff] }
  0x52   : > { %435 = vmatprep.subr.mxu0 %v930_v2  ;;  %550 = vmatprep.subr.mxu1 %v930_v2 }
  0x53   : > { %436 = vmatpush1.msra.mxu0 %v804_v28  ;;  %551 = vmatpush1.msra.mxu1 %v826_v29  ;;  %v864_v28 = vld [vmem:[%s1484_s1 + $0x308] sm:$0xff]  ;;  %v627_v29 = vrot.slane %v1284_v32, 4  ;;  %v630_v33 = vsel %vm620_vm0, %v625_v26, %v629_v25 }
  0x54   : > { %437 = vmatprep.subr.mxu0 %v930_v2  ;;  %552 = vmatprep.subr.mxu1 %v930_v2 }
  0x55   : > { %438 = vmatpush1.msra.mxu0 %v803_v35  ;;  %553 = vmatpush1.msra.mxu1 %v825_v36  ;;  %v628_v32 = vsel %vm620_vm0, %v622_v30, %v627_v29 }
  0x56   : > { %463 = vmatprep.subr.mxu0 %v930_v2  ;;  %578 = vmatprep.subr.mxu1 %v930_v2 }
  0x57   : > { %464 = vmatpush2.msra.mxu0 %v822_v38  ;;  %579 = vmatpush2.msra.mxu1 %v844_v39 }
  0x58   : > { %800 = vmatprep.mubr.msk.f32.mxu0 %vm210_vm2, %v207_v40  ;;  %802 = vmatprep.mubr.msk.f32.mxu1 %vm210_vm2, %v1044_v22 }
  0x59   : > { %465 = vmatprep.subr.mxu0 %v930_v2  ;;  %580 = vmatprep.subr.mxu1 %v930_v2 }
  0x5a   : > { %285 = vmatmul.mubr.f32.gmra.mxu0 %v205_v41  ;;  %364 = vmatmul.mubr.f32.gmra.mxu1 %v1050_v24 }
  0x5b   : > { %466 = vmatpush2.msra.mxu0 %v821_v42  ;;  %581 = vmatpush2.msra.mxu1 %v843_v43 }
  0x5c   : > { %467 = vmatprep.subr.mxu0 %v930_v2  ;;  %582 = vmatprep.subr.mxu1 %v930_v2 }
  0x5d   : > { %468 = vmatpush2.msra.mxu0 %v820_v48  ;;  %583 = vmatpush2.msra.mxu1 %v842_v49 }
  0x5e   : > { %469 = vmatprep.subr.mxu0 %v930_v2  ;;  %584 = vmatprep.subr.mxu1 %v930_v2 }
  0x5f   : > { %470 = vmatpush2.msra.mxu0 %v819_v53  ;;  %823 = vmatprep.mubr.msk.f32.mxu0 %vm210_vm2, %v396_v54 }
  0x60   : > { %585 = vmatpush2.msra.mxu1 %v841_v23  ;;  %845 = vmatprep.mubr.msk.f32.mxu1 %vm210_vm2, %v511_v55 }
  0x61   : > { %472 = vmatmul.mubr.f32.vlgmr.msra.gmra.mxu0 %v393_v56  ;;  %587 = vmatmul.mubr.f32.vlgmr.msra.gmra.mxu1 %v508_v57 }
  0x62   : > { %637 = vmatprep.subr.mxu0 %v930_v2  ;;  %872 = vmatprep.subr.mxu1 %v930_v2 }
  0x63   : > { %638 = vmatpush1.msra.mxu0 %v862_v60  ;;  %892 = vmatpush1.msra.mxu1 %v862_v60 }
  0x64   : > { %639 = vmatprep.subr.mxu0 %v930_v2  ;;  %873 = vmatprep.subr.mxu1 %v930_v2 }
  0x65   : > { %824 = vmatprep.mubr.msk.f32.mxu0 %vm210_vm2, %v400_v62  ;;  %640 = vmatpush1.msra.mxu0 %v861_v63 }
  0x66   : > { %893 = vmatpush1.msra.mxu1 %v861_v63  ;;  %477 = vmatmul.mubr.f32.gmra.mxu0 %v398_v0 }
  0x67   : > { %641 = vmatprep.subr.mxu0 %v930_v2  ;;  %874 = vmatprep.subr.mxu1 %v930_v2 }
  0x68   : > { %846 = vmatprep.mubr.msk.f32.mxu1 %vm210_vm2, %v515_v3  ;;  %642 = vmatpush1.msra.mxu0 %v860_v4 }
  0x69   : > { %894 = vmatpush1.msra.mxu1 %v860_v4  ;;  %643 = vmatprep.subr.mxu0 %v930_v2 }
  0x6a   : > { %592 = vmatmul.mubr.f32.gmra.mxu1 %v513_v5  ;;  %875 = vmatprep.subr.mxu1 %v930_v2 }
  0x6b   : > { %644 = vmatpush1.msra.mxu0 %v859_v6  ;;  %895 = vmatpush1.msra.mxu1 %v859_v6 }
  0x6c   : > { %645 = vmatprep.subr.mxu0 %v930_v2  ;;  %876 = vmatprep.subr.mxu1 %v930_v2 }
  0x6d   : > { %646 = vmatpush1.msra.mxu0 %v858_v7  ;;  %896 = vmatpush1.msra.mxu1 %v858_v7 }
  0x6e   : > { %647 = vmatprep.subr.mxu0 %v930_v2  ;;  %877 = vmatprep.subr.mxu1 %v930_v2 }
  0x6f   : > { %648 = vmatpush1.msra.mxu0 %v857_v8  ;;  %897 = vmatpush1.msra.mxu1 %v857_v8 }
  0x70   : > { %649 = vmatprep.subr.mxu0 %v930_v2  ;;  %878 = vmatprep.subr.mxu1 %v930_v2 }
  0x71   : > { %650 = vmatpush1.msra.mxu0 %v856_v9  ;;  %898 = vmatpush1.msra.mxu1 %v856_v9 }
  0x72   : > { %651 = vmatprep.subr.mxu0 %v930_v2  ;;  %879 = vmatprep.subr.mxu1 %v930_v2 }
  0x73   : > { %652 = vmatpush1.msra.mxu0 %v855_v10  ;;  %899 = vmatpush1.msra.mxu1 %v855_v10 }
  0x74   : > { %653 = vmatprep.subr.mxu0 %v930_v2  ;;  %880 = vmatprep.subr.mxu1 %v930_v2 }
  0x75   : > { %654 = vmatpush1.msra.mxu0 %v854_v11  ;;  %900 = vmatpush1.msra.mxu1 %v854_v11 }
  0x76   : > { %655 = vmatprep.subr.mxu0 %v930_v2  ;;  %881 = vmatprep.subr.mxu1 %v930_v2 }
  0x77   : > { %656 = vmatpush1.msra.mxu0 %v853_v12  ;;  %901 = vmatpush1.msra.mxu1 %v853_v12 }
  0x78   : > { %657 = vmatprep.subr.mxu0 %v930_v2  ;;  %882 = vmatprep.subr.mxu1 %v930_v2 }
  0x79   : > { %658 = vmatpush1.msra.mxu0 %v852_v13  ;;  %902 = vmatpush1.msra.mxu1 %v852_v13 }
  0x7a   : > { %659 = vmatprep.subr.mxu0 %v930_v2  ;;  %883 = vmatprep.subr.mxu1 %v930_v2 }
  0x7b   : > { %660 = vmatpush1.msra.mxu0 %v851_v14  ;;  %903 = vmatpush1.msra.mxu1 %v851_v14 }
  0x7c   : > { %661 = vmatprep.subr.mxu0 %v930_v2  ;;  %884 = vmatprep.subr.mxu1 %v930_v2 }
  0x7d   : > { %662 = vmatpush1.msra.mxu0 %v850_v15  ;;  %904 = vmatpush1.msra.mxu1 %v850_v15 }
  0x7e   : > { %663 = vmatprep.subr.mxu0 %v930_v2  ;;  %885 = vmatprep.subr.mxu1 %v930_v2 }
  0x7f   : > { %664 = vmatpush1.msra.mxu0 %v849_v16  ;;  %905 = vmatpush1.msra.mxu1 %v849_v16 }
  0x80   : > { %665 = vmatprep.subr.mxu0 %v930_v2  ;;  %886 = vmatprep.subr.mxu1 %v930_v2 }
  0x81   : > { %666 = vmatpush1.msra.mxu0 %v848_v17  ;;  %906 = vmatpush1.msra.mxu1 %v848_v17 }
  0x82   : > { %667 = vmatprep.subr.mxu0 %v930_v2  ;;  %887 = vmatprep.subr.mxu1 %v930_v2 }
  0x83   : > { %668 = vmatpush1.msra.mxu0 %v847_v18  ;;  %907 = vmatpush1.msra.mxu1 %v847_v18 }
  0x84   : > { %693 = vmatprep.subr.mxu0 %v930_v2  ;;  %888 = vmatprep.subr.mxu1 %v930_v2 }
  0x85   : > { %694 = vmatpush2.msra.mxu0 %v866_v19  ;;  %908 = vmatpush2.msra.mxu1 %v866_v19 }
  0x86   : > { %695 = vmatprep.subr.mxu0 %v930_v2  ;;  %889 = vmatprep.subr.mxu1 %v930_v2 }
  0x87   : > { %696 = vmatpush2.msra.mxu0 %v865_v20  ;;  %909 = vmatpush2.msra.mxu1 %v865_v20 }
  0x88   : > { %697 = vmatprep.subr.mxu0 %v930_v2  ;;  %890 = vmatprep.subr.mxu1 %v930_v2 }
  0x89   : > { %698 = vmatpush2.msra.mxu0 %v864_v28  ;;  %910 = vmatpush2.msra.mxu1 %v864_v28 }
  0x8a   : > { %699 = vmatprep.subr.mxu0 %v930_v2  ;;  %891 = vmatprep.subr.mxu1 %v930_v2 }
  0x8b   : > { %700 = vmatpush2.msra.mxu0 %v863_v27  ;;  %911 = vmatpush2.msra.mxu1 %v863_v27 }
  0x8c   : > { %867 = vmatprep.mubr.msk.f32.mxu0 %vm210_vm2, %v1067_v31  ;;  %868 = vmatprep.mubr.msk.f32.mxu1 %vm210_vm2, %v630_v33 }
  0x8d   : > { %702 = vmatmul.mubr.f32.vlgmr.msra.gmra.mxu0 %v1080_v34  ;;  %707 = vmatmul.mubr.f32.vlgmr.msra.gmra.mxu1 %v628_v32 }
  0xf5   : > { %v281_v22 = vpop.f32.mrf.mxu0  ;;  %v360_v26 = vpop.f32.mrf.mxu1 }
  0xf6   : > { %v361_v35 = vadd.f32 %v360_v26, %v281_v22 }
  0xf7   : > { %v283_v36 = vpop.f32.mrf.mxu0  ;;  %v362_v37 = vpop.f32.mrf.mxu1 }
 0x11a   : > { %v286_v2 = vpop.f32.mrf.mxu0  ;;  %v365_v24 = vpop.f32.mrf.mxu1 }
 0x11b   : > { %v366_v34 = vadd.f32 %v365_v24, %v286_v2 }
 0x11c   : > { %v288_v38 = vpop.f32.mrf.mxu0  ;;  %v367_v30 = vpop.f32.mrf.mxu1 }
 0x121   : > { %v473_v39 = vpop.f32.mrf.mxu0  ;;  %v588_v40 = vpop.f32.mrf.mxu1 }
 0x122   : > { %v482_v46 = vadd.f32 %v473_v39, %v361_v35 }
 0x123   : > { %v475_v41 = vpop.f32.mrf.mxu0  ;;  %v590_v42 = vpop.f32.mrf.mxu1 }
 0x124   : > { %v597_v48 = vadd.f32 %v588_v40, %v482_v46 }
 0x126   : > { %v478_v31 = vpop.f32.mrf.mxu0 }
 0x127   : > { %v483_v47 = vadd.f32 %v478_v31, %v366_v34 }
 0x128   : > { %v480_v43 = vpop.f32.mrf.mxu0 }
 0x12a   : > { %v593_v44 = vpop.f32.mrf.mxu1 }
 0x12b   : > { %v598_v49 = vadd.f32 %v593_v44, %v483_v47 }
 0x12c   : > { %v595_v45 = vpop.f32.mrf.mxu1 }
 0x14d   : > { %v703_v50 = vpop.f32.mrf.mxu0  ;;  %v708_v51 = vpop.f32.mrf.mxu1 }
 0x14e   : > { %v712_v52 = vadd.f32 %v703_v50, %v597_v48  ;;  %v713_v21 = vadd.f32 %v708_v51, %v598_v49 }
 0x14f   : > { %v705_v53 = vpop.f32.mrf.mxu0  ;;  %v710_v54 = vpop.f32.mrf.mxu1 }
 0x150   : > { %714 = vst [vmem:[%s143_s13] sm:$0xff] %v712_v52  ;;  %715 = vst [vmem:[%s143_s13 + $0x8] sm:$0xff] %v713_v21 }
 0x151 PF: > { %s12_s9 = sadd.s32 1, %s928_s9  }
 0x152   : > { %p9_p4 = scmp.ge.s32.totalorder %s12_s9, 4  }
 0x154   :  { %11 = sbr.rel (!%p9_p4) target bundleno = 1 (0x1), region = 62 }

// kernel: rpn_forward.3
= control target key start
LH: loop header
LB: loop body
LE: loop exit
PB: predicated region body
PF: predicated region fallthrough
CT: control target
= control target key end

     0   :  { %14 = vsyncpa [#allocation3], 0  ;;  %s2323_s0 = inlined_call_operand.vmem [shape: f32[512,8], index: 0, kind: input, shape index: {}]   ;;  %s2324_s1 = inlined_call_operand.vmem [shape: bf16[8,256], index: 1, kind: input, shape index: {}]   ;;  %s2325_s2 = inlined_call_operand.vmem [shape: f32[1,256], index: 2, kind: input, shape index: {}]   ;;  %s2326_s3 = inlined_call_operand.vmem [shape: f32[1,256], index: 3, kind: input, shape index: {}]   ;;  %s2327_s4 = inlined_call_operand.vmem [shape: f32[1,256], index: 4, kind: input, shape index: {}]   ;;  %s2328_s5 = inlined_call_operand.vmem [shape: bf16[256,128], index: 5, kind: input, shape index: {}]   ;;  %s2329_s6 = inlined_call_operand.vmem [shape: f32[1,128], index: 6, kind: input, shape index: {}]   ;;  %s2330_s7 = inlined_call_operand.hbm [shape: f32[512,256], index: 7, kind: output, shape index: {0}]   ;;  %s2331_s8 = inlined_call_operand.vmem [shape: f32[512,128], index: 8, kind: output, shape index: {1}]  }
   0x1   :  { %16 = vsyncpa [#allocation3 + $0x1], 0  ;;  %s1740_s27 = smov 0   ;;  %s1742_s28 = smov 0  }
   0x2   :  { %s1744_s29 = smov 0   ;;  %s1746_s30 = smov 0  }
   0x3 LB: > { %s1761_s9 = sadd.s32 4294967295, %s1689_s30   ;;  %s1388_s10 = sadd.s32 4294967294, %s1689_s30   ;;  %s1689_s30 = sphi %s1746_s30, %s2339_s30   ;;  %s1685_s29 = sphi %s1744_s29, %s2338_s29   ;;  %s1681_s28 = sphi %s1742_s28, %s2337_s28   ;;  %s1677_s27 = sphi %s1740_s27, %s2336_s27  }
   0x4   : > { %s1765_s11 = sadd.s32 1, %s1689_s30   ;;  %s181_s12 = sadd.s32 1, %s1685_s29 }
   0x5   : > { %s178_s13 = ssub.s32 %s1689_s30, %s1765_s11  ;;  %p191_p0 = scmp.ne.s32.totalorder %s1685_s29, %s1681_s28 }
   0x6   : > { %p179_p1 = scmp.eq.s32.totalorder %s178_s13, 0  ;;  %p192_p2 = scmp.eq.s32.totalorder %s1761_s9, 1 }
   0x7   : > { %p197_p3 = scmp.ne.s32.totalorder %s1681_s28, %s1677_s27  ;;  %p198_p4 = scmp.eq.s32.totalorder %s1388_s10, 1 }
   0x8   : > { %s1776_s14 = scalar_select %p179_p1, %s1685_s29, %s181_s12  }
   0x9   : > { %p1778_p5 = por %p192_p2, %p191_p0  ;;  %p1782_p6 = por %p198_p4, %p197_p3 }
   0xa   : > { %p1391_p7 = scmp.ge.s32.totalorder %s1689_s30, 1  ;;  %p269_p8 = scmp.lt.s32.totalorder %s1689_s30, 3 }
   0xc   : > { %p270_p9 = pnand %p1391_p7, %p269_p8 }
   0xd   : > { %s1393_s19 = sshll.u32 (!%p270_p9), %s1761_s9, 5  ;;  %s2332_s18 = sand.u32 (!%p270_p9), 1, %s1681_s28  }
   0xe   : > { %273 = sbr.rel (%p270_p9) target bundleno = 570 (0x23a), region = 48  ;;  %p309_p10 = scmp.lt.s32.totalorder (!%p270_p9), %s1393_s19, 63 }
   0xf   : > { %s1392_s20 = sshll.u32 (!%p270_p9), %s2332_s18, 9  ;;  %s1440_s12 = sshll.u32 (!%p270_p9), %s1761_s9, 13 }
  0x10   : > { %s1947_s21 = scalar_lea.vmem (!%p270_p9), [#allocation2], %s1392_s20  ;;  %s2213_s18 = scalar_lea.hbm (!%p270_p9), %s2330_s7, %s1440_s12 }
  0x11   : > { %s1297_s17 = sshll.u32 (!%p270_p9), %s1947_s21, 4  ;;  %s2215_s17 = int_to_ptr.vmem [resolvable:$true] %s1297_s17 }
  0x12   : > { %s1629_s9 = scalar_lea.vmem (!%p270_p9), %s2215_s17, 8192 }
  0x13   : > { %v370_v0 = vld [vmem:[%s2324_s1] sm:$0xff]  ;;  %vm437_vm0 = vcmask 1043456   ;;  %v1691_v3 = vmov 0   ;;  %v1613_v4 = vld [vmem:[%s2328_s5 + $0x78] sm:$0xff]   ;;  %s2341_s19 = smov (!%p309_p10, %s1393_s19), 63  ;;  %v1615_v7 = vld [vmem:[%s2328_s5 + $0x70] sm:$0xff]   ;;  %p1630_p11 = scmp.ne.s32.totalorder %s2215_s17, %s1629_s9 }
  0x14   : > { %v1398_v1 = vcombine.high %v370_v0, %v370_v0  ;;  %v1397_v2 = vcombine.low %v370_v0, %v370_v0  ;;  %476 = vmatprep.mubr.bf16.mxu0 %v1691_v3  ;;  %v1614_v6 = vld [vmem:[%s2328_s5 + $0x38] sm:$0xff]   ;;  %1553 = vmatprep.subr.bf16.mxu1 %v1613_v4  ;;  %s1394_s26 = sshll.u32 %s2341_s19, 3  ;;  %vm388_vm1 = vcmask 64512   ;;  %v1616_v10 = vld [vmem:[%s2328_s5 + $0x30] sm:$0xff]   ;;  %v1617_v12 = vld [vmem:[%s2328_s5 + $0x68] sm:$0xff]   ;;  %s2335_s19 = sand.u32 1, %s1681_s28  }
  0x15   : > { %1561 = vmatpush3.bf16.msra.mxu1 %v1614_v6  ;;  %s1810_s13 = scalar_lea.vmem %s2323_s0, %s1394_s26  ;;  %v1618_v18 = vld [vmem:[%s2328_s5 + $0x28] sm:$0xff]   ;;  %v1619_v19 = vld [vmem:[%s2328_s5 + $0x60] sm:$0xff]   ;;  %v1621_v40 = vld [vmem:[%s2328_s5 + $0x58] sm:$0xff]   ;;  %s2201_s24 = scalar_lea.vmem %s2331_s8, %s1394_s26 }
  0x16   : > { %1399 = vmatprep.subr.msk.bf16.mxu0 %vm437_vm0, %v1398_v1  ;;  %v439_v5 = vsel %vm437_vm0, %v1397_v2, 0  ;;  %1554 = vmatprep.subr.bf16.mxu1 %v1615_v7  ;;  %v322_v8 = vld [vmem:[%s1810_s13] sm:$0xff]  ;;  %v323_v9 = vld [vmem:[%s1810_s13 + $0x8] sm:$0xff]  ;;  %v324_v13 = vld [vmem:[%s1810_s13 + $0x10] sm:$0xff]  ;;  %s2220_s26 = scalar_lea.sflag [#allocation3], %s2335_s19  ;;  %p1631_p12 = pnand %p1630_p11, %p1778_p5 }
  0x17   : > { %459 = vmatpush1.bf16.msra.mxu0 %v439_v5  ;;  %v354_v11 = vpack.c.bf16 %v323_v9, %v322_v8  ;;  %v325_v14 = vld [vmem:[%s1810_s13 + $0x18] sm:$0xff]  ;;  %v326_v16 = vld [vmem:[%s1810_s13 + $0x20] sm:$0xff]  ;;  %v327_v17 = vld [vmem:[%s1810_s13 + $0x28] sm:$0xff] }
  0x18   : > { %1441 = vmatprep.subr.bf16.mxu0 %v1613_v4  ;;  %v355_v15 = vpack.c.bf16 %v325_v14, %v324_v13  ;;  %v1620_v20 = vld [vmem:[%s2328_s5 + $0x20] sm:$0xff]   ;;  %v356_v21 = vpack.c.bf16 %v327_v17, %v326_v16  ;;  %v328_v22 = vld [vmem:[%s1810_s13 + $0x30] sm:$0xff]  ;;  %v329_v23 = vld [vmem:[%s1810_s13 + $0x38] sm:$0xff]  ;;  %p1632_p13 = pneg %p1631_p12 }
  0x19   : > { %1562 = vmatpush3.bf16.msra.mxu1 %v1616_v10  ;;  %v357_v24 = vpack.c.bf16 %v329_v23, %v328_v22  ;;  %v330_v25 = vld [vmem:[%s1810_s13 + $0x40] sm:$0xff]  ;;  %v331_v26 = vld [vmem:[%s1810_s13 + $0x48] sm:$0xff]  ;;  %v332_v28 = vld [vmem:[%s1810_s13 + $0x50] sm:$0xff] }
  0x1a   : > { %1400 = vmatmul.mubr.msk.bf16.vlgmr.msra.gmra.mxu0 %vm388_vm1, %v354_v11  ;;  %1555 = vmatprep.subr.bf16.mxu1 %v1617_v12  ;;  %v358_v27 = vpack.c.bf16 %v331_v26, %v330_v25  ;;  %v333_v29 = vld [vmem:[%s1810_s13 + $0x58] sm:$0xff]  ;;  %v334_v31 = vld [vmem:[%s1810_s13 + $0x60] sm:$0xff]  ;;  %v335_v32 = vld [vmem:[%s1810_s13 + $0x68] sm:$0xff] }
  0x1b   : > { %486 = vmatprep.mubr.bf16.mxu0 %v1691_v3  ;;  %1442 = vmatpush3.bf16.msra.mxu0 %v1614_v6  ;;  %v359_v30 = vpack.c.bf16 %v333_v29, %v332_v28  ;;  %v360_v33 = vpack.c.bf16 %v335_v32, %v334_v31  ;;  %v336_v34 = vld [vmem:[%s1810_s13 + $0x70] sm:$0xff]  ;;  %v337_v35 = vld [vmem:[%s1810_s13 + $0x78] sm:$0xff]  ;;  %v338_v37 = vld [vmem:[%s1810_s13 + $0x80] sm:$0xff]  ;;  %v373_v6 = vlaneseq }
  0x1c   : > { %1443 = vmatprep.subr.bf16.mxu0 %v1615_v7  ;;  %v361_v36 = vpack.c.bf16 %v337_v35, %v336_v34  ;;  %v339_v38 = vld [vmem:[%s1810_s13 + $0x88] sm:$0xff]  ;;  %v340_v41 = vld [vmem:[%s1810_s13 + $0x90] sm:$0xff]  ;;  %v341_v42 = vld [vmem:[%s1810_s13 + $0x98] sm:$0xff] }
  0x1d   : > { %1563 = vmatpush3.bf16.msra.mxu1 %v1618_v18  ;;  %v362_v39 = vpack.c.bf16 %v339_v38, %v338_v37  ;;  %v1622_v43 = vld [vmem:[%s2328_s5 + $0x18] sm:$0xff]   ;;  %v363_v44 = vpack.c.bf16 %v341_v42, %v340_v41  ;;  %v1623_v45 = vld [vmem:[%s2328_s5 + $0x50] sm:$0xff]   ;;  %v1625_v47 = vld [vmem:[%s2328_s5 + $0x48] sm:$0xff]   ;;  %v374_v7 = vshrl.u32 %v373_v6, 7 }
  0x1e   : > { %1556 = vmatprep.subr.bf16.mxu1 %v1619_v19  ;;  %v1624_v46 = vld [vmem:[%s2328_s5 + $0x10] sm:$0xff]   ;;  %v342_v48 = vld [vmem:[%s1810_s13 + $0xa0] sm:$0xff]  ;;  %v343_v49 = vld [vmem:[%s1810_s13 + $0xa8] sm:$0xff] }
  0x1f   : > { %1444 = vmatpush3.bf16.msra.mxu0 %v1616_v10  ;;  %v1626_v50 = vld [vmem:[%s2328_s5 + $0x8] sm:$0xff]   ;;  %v364_v51 = vpack.c.bf16 %v343_v49, %v342_v48  ;;  %v1627_v52 = vld [vmem:[%s2328_s5 + $0x40] sm:$0xff]   ;;  %v344_v54 = vld [vmem:[%s1810_s13 + $0xb0] sm:$0xff]  ;;  %v375_v8 = vsub.s32 0, %v374_v7  ;;  %v379_v10 = vsub.s32 1, %v374_v7 }
  0x20   : > { %1445 = vmatprep.subr.bf16.mxu0 %v1617_v12  ;;  %v1628_v53 = vld [vmem:[%s2328_s5] sm:$0xff]   ;;  %v345_v55 = vld [vmem:[%s1810_s13 + $0xb8] sm:$0xff]  ;;  %v347_v58 = vld [vmem:[%s1810_s13 + $0xc8] sm:$0xff] }
  0x21   : > { %1564 = vmatpush3.bf16.msra.mxu1 %v1620_v20  ;;  %v365_v56 = vpack.c.bf16 %v345_v55, %v344_v54  ;;  %v346_v57 = vld [vmem:[%s1810_s13 + $0xc0] sm:$0xff]  ;;  %v348_v60 = vld [vmem:[%s1810_s13 + $0xd0] sm:$0xff]  ;;  %v349_v61 = vld [vmem:[%s1810_s13 + $0xd8] sm:$0xff] }
  0x22   : > { %1401 = vmatmul.mubr.msk.bf16.gmra.mxu0 %vm388_vm1, %v355_v15  ;;  %1557 = vmatprep.subr.bf16.mxu1 %v1621_v40  ;;  %v366_v59 = vpack.c.bf16 %v347_v58, %v346_v57  ;;  %v367_v62 = vpack.c.bf16 %v349_v61, %v348_v60  ;;  %v350_v63 = vld [vmem:[%s1810_s13 + $0xe0] sm:$0xff]  ;;  %v351_v0 = vld [vmem:[%s1810_s13 + $0xe8] sm:$0xff]  ;;  %v352_v2 = vld [vmem:[%s1810_s13 + $0xf0] sm:$0xff] }
  0x23   : > { %496 = vmatprep.mubr.bf16.mxu0 %v1691_v3  ;;  %1446 = vmatpush3.bf16.msra.mxu0 %v1618_v18  ;;  %v368_v1 = vpack.c.bf16 %v351_v0, %v350_v63  ;;  %v353_v4 = vld [vmem:[%s1810_s13 + $0xf8] sm:$0xff]  ;;  %v371_v9 = vld [vmem:[%s2325_s2] sm:$0x3] }
  0x24   : > { %1447 = vmatprep.subr.bf16.mxu0 %v1619_v19  ;;  %v369_v5 = vpack.c.bf16 %v353_v4, %v352_v2  ;;  %v637_v11 = vld [vmem:[%s2326_s3] sm:$0x3]  ;;  %v1920_v12 = vrot.slane %v371_v9, %v375_v8  ;;  %v1927_v14 = vrot.slane %v371_v9, %v379_v10 }
  0x25   : > { %1565 = vmatpush3.bf16.msra.mxu1 %v1622_v43  ;;  %v1925_v13 = vrot.slane %v637_v11, %v375_v8  ;;  %v1933_v18 = vrot.slane %v637_v11, %v379_v10 }
  0x26   : > { %1558 = vmatprep.subr.bf16.mxu1 %v1623_v45 }
  0x27   : > { %1448 = vmatpush3.bf16.msra.mxu0 %v1620_v20 }
  0x28   : > { %1449 = vmatprep.subr.bf16.mxu0 %v1621_v40 }
  0x29   : > { %1566 = vmatpush3.bf16.msra.mxu1 %v1624_v46 }
  0x2a   : > { %1402 = vmatmul.mubr.msk.bf16.gmra.mxu0 %vm388_vm1, %v356_v21  ;;  %1559 = vmatprep.subr.bf16.mxu1 %v1625_v47 }
  0x2b   : > { %506 = vmatprep.mubr.bf16.mxu0 %v1691_v3  ;;  %1450 = vmatpush3.bf16.msra.mxu0 %v1622_v43 }
  0x2c   : > { %1451 = vmatprep.subr.bf16.mxu0 %v1623_v45 }
  0x2d   : > { %1567 = vmatpush3.bf16.msra.mxu1 %v1626_v50 }
  0x2e   : > { %1560 = vmatprep.subr.bf16.mxu1 %v1627_v52 }
  0x2f   : > { %1452 = vmatpush3.bf16.msra.mxu0 %v1624_v46 }
  0x30   : > { %1453 = vmatprep.subr.bf16.mxu0 %v1625_v47 }
  0x31   : > { %1568 = vmatpush3.bf16.msra.mxu1 %v1628_v53 }
  0x32   : > { %1403 = vmatmul.mubr.msk.bf16.gmra.mxu0 %vm388_vm1, %v357_v24 }
  0x33   : > { %516 = vmatprep.mubr.bf16.mxu0 %v1691_v3  ;;  %1454 = vmatpush3.bf16.msra.mxu0 %v1626_v50 }
  0x34   : > { %1455 = vmatprep.subr.bf16.mxu0 %v1627_v52 }
  0x37   : > { %1456 = vmatpush3.bf16.msra.mxu0 %v1628_v53 }
  0x3a   : > { %1404 = vmatmul.mubr.msk.bf16.gmra.mxu0 %vm388_vm1, %v358_v27 }
  0x3b   : > { %526 = vmatprep.mubr.bf16.mxu0 %v1691_v3 }
  0x42   : > { %1405 = vmatmul.mubr.msk.bf16.gmra.mxu0 %vm388_vm1, %v359_v30 }
  0x43   : > { %536 = vmatprep.mubr.bf16.mxu0 %v1691_v3 }
  0x4a   : > { %1406 = vmatmul.mubr.msk.bf16.gmra.mxu0 %vm388_vm1, %v360_v33 }
  0x4b   : > { %546 = vmatprep.mubr.bf16.mxu0 %v1691_v3 }
  0x52   : > { %1407 = vmatmul.mubr.msk.bf16.gmra.mxu0 %vm388_vm1, %v361_v36 }
  0x53   : > { %556 = vmatprep.mubr.bf16.mxu0 %v1691_v3 }
  0x5a   : > { %1408 = vmatmul.mubr.msk.bf16.gmra.mxu0 %vm388_vm1, %v362_v39 }
  0x5b   : > { %566 = vmatprep.mubr.bf16.mxu0 %v1691_v3 }
  0x62   : > { %1409 = vmatmul.mubr.msk.bf16.gmra.mxu0 %vm388_vm1, %v363_v44 }
  0x63   : > { %576 = vmatprep.mubr.bf16.mxu0 %v1691_v3 }
  0x6a   : > { %1410 = vmatmul.mubr.msk.bf16.gmra.mxu0 %vm388_vm1, %v364_v51 }
  0x6b   : > { %586 = vmatprep.mubr.bf16.mxu0 %v1691_v3 }
  0x72   : > { %1411 = vmatmul.mubr.msk.bf16.gmra.mxu0 %vm388_vm1, %v365_v56 }
  0x73   : > { %596 = vmatprep.mubr.bf16.mxu0 %v1691_v3 }
  0x7a   : > { %1412 = vmatmul.mubr.msk.bf16.gmra.mxu0 %vm388_vm1, %v366_v59 }
  0x7b   : > { %606 = vmatprep.mubr.bf16.mxu0 %v1691_v3 }
  0x82   : > { %1413 = vmatmul.mubr.msk.bf16.gmra.mxu0 %vm388_vm1, %v367_v62 }
  0x83   : > { %616 = vmatprep.mubr.bf16.mxu0 %v1691_v3 }
  0x8a   : > { %1414 = vmatmul.mubr.msk.bf16.gmra.mxu0 %vm388_vm1, %v368_v1 }
  0x8b   : > { %626 = vmatprep.mubr.bf16.mxu0 %v1691_v3  ;;  %v713_v3 = vld [vmem:[%s2327_s4] sm:$0x3] }
  0x8c   : > { %v1931_v17 = vrot.slane %v713_v3, %v375_v8  ;;  %v1939_v22 = vrot.slane %v713_v3, %v379_v10 }
  0x92   : > { %1415 = vmatmul.mubr.msk.bf16.gmra.mxu0 %vm388_vm1, %v369_v5 }
  0xda   : > { %v478_v15 = vpop.f32.mrf.mxu0 }
  0xdb   : > { %v479_v16 = vadd.f32 %v478_v15, %v1920_v12 }
  0xdc   : > { %v480_v19 = vpop.f32.mrf.mxu0 }
  0xdd   : > { %v649_v20 = vmul.f32 %v1925_v13, %v479_v16  ;;  %v481_v21 = vadd.f32 %v480_v19, %v1927_v14 }
  0xde   : > { %v482_v23 = vpop.f32.mrf.mxu0 }
  0xdf   : > { %v725_v24 = vadd.f32 %v1931_v17, %v649_v20  ;;  %v650_v25 = vmul.f32 %v1933_v18, %v481_v21  ;;  %v483_v26 = vadd.f32 %v482_v23, %v1920_v12 }
  0xe0   : > { %v484_v27 = vpop.f32.mrf.mxu0 }
  0xe1   : > { %v789_v28 = vmax.f32 %v725_v24, 0.0  ;;  %v726_v29 = vadd.f32 %v1939_v22, %v650_v25  ;;  %v651_v30 = vmul.f32 %v1925_v13, %v483_v26  ;;  %v485_v31 = vadd.f32 %v484_v27, %v1927_v14 }
  0xe2   : > { %v488_v32 = vpop.f32.mrf.mxu0 }
  0xe3   : > { %853 = vst [vmem:[%s1947_s21] sm:$0xff] %v789_v28  ;;  %v790_v33 = vmax.f32 %v726_v29, 0.0  ;;  %v727_v34 = vadd.f32 %v1931_v17, %v651_v30  ;;  %v652_v35 = vmul.f32 %v1933_v18, %v485_v31  ;;  %v489_v36 = vadd.f32 %v488_v32, %v1920_v12 }
  0xe4   : > { %v490_v37 = vpop.f32.mrf.mxu0 }
  0xe5   : > { %854 = vst [vmem:[%s1947_s21 + $0x8] sm:$0xff] %v790_v33  ;;  %v791_v38 = vmax.f32 %v727_v34, 0.0  ;;  %v728_v39 = vadd.f32 %v1939_v22, %v652_v35  ;;  %v653_v40 = vmul.f32 %v1925_v13, %v489_v36  ;;  %v491_v41 = vadd.f32 %v490_v37, %v1927_v14 }
  0xe6   : > { %v492_v42 = vpop.f32.mrf.mxu0 }
  0xe7   : > { %855 = vst [vmem:[%s1947_s21 + $0x10] sm:$0xff] %v791_v38  ;;  %v792_v43 = vmax.f32 %v728_v39, 0.0  ;;  %v729_v44 = vadd.f32 %v1931_v17, %v653_v40  ;;  %v654_v45 = vmul.f32 %v1933_v18, %v491_v41  ;;  %v493_v46 = vadd.f32 %v492_v42, %v1920_v12 }
  0xe8   : > { %v494_v47 = vpop.f32.mrf.mxu0  ;;  %v917_v52 = vpack.c.bf16 %v791_v38, %v789_v28 }
  0xe9   : > { %856 = vst [vmem:[%s1947_s21 + $0x18] sm:$0xff] %v792_v43  ;;  %v793_v48 = vmax.f32 %v729_v44, 0.0  ;;  %v495_v49 = vadd.f32 %v494_v47, %v1927_v14  ;;  %v918_v50 = vpack.c.bf16 %v792_v43, %v790_v33  ;;  %v730_v51 = vadd.f32 %v1939_v22, %v654_v45 }
  0xea   : > { %v655_v53 = vmul.f32 %v1925_v13, %v493_v46  ;;  %v498_v54 = vpop.f32.mrf.mxu0 }
  0xeb   : > { %857 = vst [vmem:[%s1947_s21 + $0x20] sm:$0xff] %v793_v48  ;;  %v656_v55 = vmul.f32 %v1933_v18, %v495_v49  ;;  %v499_v56 = vadd.f32 %v498_v54, %v1920_v12  ;;  %1116 = vmatprep.mubr.bf16.mxu0 %v918_v50  ;;  %v794_v57 = vmax.f32 %v730_v51, 0.0 }
  0xec   : > { %v731_v58 = vadd.f32 %v1931_v17, %v655_v53  ;;  %v500_v59 = vpop.f32.mrf.mxu0  ;;  %1117 = vmatmul.mubr.bf16.vlgmr.msra.gmra.mxu0 %v917_v52 }
  0xed   : > { %v657_v60 = vmul.f32 %v1925_v13, %v499_v56  ;;  %v501_v61 = vadd.f32 %v500_v59, %v1927_v14  ;;  %v732_v62 = vadd.f32 %v1939_v22, %v656_v55  ;;  %858 = vst [vmem:[%s1947_s21 + $0x28] sm:$0xff] %v794_v57 }
  0xee   : > { %v795_v63 = vmax.f32 %v731_v58, 0.0  ;;  %v502_v0 = vpop.f32.mrf.mxu0 }
  0xef   : > { %v733_v1 = vadd.f32 %v1931_v17, %v657_v60  ;;  %v658_v2 = vmul.f32 %v1933_v18, %v501_v61  ;;  %v503_v4 = vadd.f32 %v502_v0, %v1920_v12  ;;  %v796_v5 = vmax.f32 %v732_v62, 0.0 }
  0xf0   : > { %859 = vst [vmem:[%s1947_s21 + $0x30] sm:$0xff] %v795_v63  ;;  %v504_v6 = vpop.f32.mrf.mxu0  ;;  %v919_v15 = vpack.c.bf16 %v795_v63, %v793_v48 }
  0xf1   : > { %v797_v7 = vmax.f32 %v733_v1, 0.0  ;;  %v734_v8 = vadd.f32 %v1939_v22, %v658_v2  ;;  %v659_v9 = vmul.f32 %v1925_v13, %v503_v4  ;;  %v505_v10 = vadd.f32 %v504_v6, %v1927_v14  ;;  %860 = vst [vmem:[%s1947_s21 + $0x38] sm:$0xff] %v796_v5 }
  0xf2   : > { %v508_v11 = vpop.f32.mrf.mxu0  ;;  %v920_v3 = vpack.c.bf16 %v796_v5, %v794_v57 }
  0xf3   : > { %861 = vst [vmem:[%s1947_s21 + $0x40] sm:$0xff] %v797_v7  ;;  %v798_v16 = vmax.f32 %v734_v8, 0.0  ;;  %v735_v19 = vadd.f32 %v1931_v17, %v659_v9  ;;  %v660_v20 = vmul.f32 %v1933_v18, %v505_v10  ;;  %v509_v21 = vadd.f32 %v508_v11, %v1920_v12 }
  0xf4   : > { %1124 = vmatprep.mubr.bf16.mxu1 %v920_v3  ;;  %v510_v23 = vpop.f32.mrf.mxu0 }
  0xf5   : > { %862 = vst [vmem:[%s1947_s21 + $0x48] sm:$0xff] %v798_v16  ;;  %v799_v24 = vmax.f32 %v735_v19, 0.0  ;;  %v736_v25 = vadd.f32 %v1939_v22, %v660_v20  ;;  %v661_v26 = vmul.f32 %v1925_v13, %v509_v21  ;;  %v511_v27 = vadd.f32 %v510_v23, %v1927_v14  ;;  %1125 = vmatmul.mubr.bf16.vlgmr.msra.gmra.mxu1 %v919_v15 }
  0xf6   : > { %v512_v28 = vpop.f32.mrf.mxu0 }
  0xf7   : > { %863 = vst [vmem:[%s1947_s21 + $0x50] sm:$0xff] %v799_v24  ;;  %v800_v29 = vmax.f32 %v736_v25, 0.0  ;;  %v737_v30 = vadd.f32 %v1931_v17, %v661_v26  ;;  %v662_v31 = vmul.f32 %v1933_v18, %v511_v27  ;;  %v513_v32 = vadd.f32 %v512_v28, %v1920_v12 }
  0xf8   : > { %v514_v33 = vpop.f32.mrf.mxu0  ;;  %v921_v40 = vpack.c.bf16 %v799_v24, %v797_v7 }
  0xf9   : > { %864 = vst [vmem:[%s1947_s21 + $0x58] sm:$0xff] %v800_v29  ;;  %v801_v34 = vmax.f32 %v737_v30, 0.0  ;;  %v738_v35 = vadd.f32 %v1939_v22, %v662_v31  ;;  %v663_v36 = vmul.f32 %v1925_v13, %v513_v32  ;;  %v515_v37 = vadd.f32 %v514_v33, %v1927_v14 }
  0xfa   : > { %v518_v38 = vpop.f32.mrf.mxu0  ;;  %v922_v39 = vpack.c.bf16 %v800_v29, %v798_v16 }
  0xfb   : > { %865 = vst [vmem:[%s1947_s21 + $0x60] sm:$0xff] %v801_v34  ;;  %v802_v41 = vmax.f32 %v738_v35, 0.0  ;;  %v739_v42 = vadd.f32 %v1931_v17, %v663_v36  ;;  %v664_v43 = vmul.f32 %v1933_v18, %v515_v37  ;;  %v519_v44 = vadd.f32 %v518_v38, %v1920_v12 }
  0xfc   : > { %1132 = vmatprep.mubr.bf16.mxu1 %v922_v39  ;;  %v520_v45 = vpop.f32.mrf.mxu0 }
  0xfd   : > { %866 = vst [vmem:[%s1947_s21 + $0x68] sm:$0xff] %v802_v41  ;;  %v803_v46 = vmax.f32 %v739_v42, 0.0  ;;  %v740_v47 = vadd.f32 %v1939_v22, %v664_v43  ;;  %v665_v48 = vmul.f32 %v1925_v13, %v519_v44  ;;  %v521_v49 = vadd.f32 %v520_v45, %v1927_v14  ;;  %1133 = vmatmul.mubr.bf16.gmra.mxu1 %v921_v40 }
  0xfe   : > { %v522_v50 = vpop.f32.mrf.mxu0 }
  0xff   : > { %867 = vst [vmem:[%s1947_s21 + $0x70] sm:$0xff] %v803_v46  ;;  %v804_v51 = vmax.f32 %v740_v47, 0.0  ;;  %v741_v52 = vadd.f32 %v1931_v17, %v665_v48  ;;  %v666_v53 = vmul.f32 %v1933_v18, %v521_v49  ;;  %v523_v54 = vadd.f32 %v522_v50, %v1920_v12 }
 0x100   : > { %v524_v55 = vpop.f32.mrf.mxu0  ;;  %v923_v62 = vpack.c.bf16 %v803_v46, %v801_v34 }
 0x101   : > { %868 = vst [vmem:[%s1947_s21 + $0x78] sm:$0xff] %v804_v51  ;;  %v805_v56 = vmax.f32 %v741_v52, 0.0  ;;  %v742_v57 = vadd.f32 %v1939_v22, %v666_v53  ;;  %v667_v58 = vmul.f32 %v1925_v13, %v523_v54  ;;  %v525_v59 = vadd.f32 %v524_v55, %v1927_v14 }
 0x102   : > { %v528_v60 = vpop.f32.mrf.mxu0  ;;  %v924_v61 = vpack.c.bf16 %v804_v51, %v802_v41 }
 0x103   : > { %869 = vst [vmem:[%s1947_s21 + $0x80] sm:$0xff] %v805_v56  ;;  %v806_v63 = vmax.f32 %v742_v57, 0.0  ;;  %v743_v0 = vadd.f32 %v1931_v17, %v667_v58  ;;  %v668_v1 = vmul.f32 %v1933_v18, %v525_v59  ;;  %v529_v2 = vadd.f32 %v528_v60, %v1920_v12 }
 0x104   : > { %1140 = vmatprep.mubr.bf16.mxu1 %v924_v61  ;;  %v530_v4 = vpop.f32.mrf.mxu0 }
 0x105   : > { %870 = vst [vmem:[%s1947_s21 + $0x88] sm:$0xff] %v806_v63  ;;  %v807_v5 = vmax.f32 %v743_v0, 0.0  ;;  %v744_v6 = vadd.f32 %v1939_v22, %v668_v1  ;;  %v669_v7 = vmul.f32 %v1925_v13, %v529_v2  ;;  %v531_v8 = vadd.f32 %v530_v4, %v1927_v14  ;;  %1141 = vmatmul.mubr.bf16.gmra.mxu1 %v923_v62 }
 0x106   : > { %v532_v9 = vpop.f32.mrf.mxu0 }
 0x107   : > { %871 = vst [vmem:[%s1947_s21 + $0x90] sm:$0xff] %v807_v5  ;;  %v808_v10 = vmax.f32 %v744_v6, 0.0  ;;  %v745_v11 = vadd.f32 %v1931_v17, %v669_v7  ;;  %v670_v3 = vmul.f32 %v1933_v18, %v531_v8  ;;  %v533_v15 = vadd.f32 %v532_v9, %v1920_v12 }
 0x108   : > { %v534_v16 = vpop.f32.mrf.mxu0  ;;  %v925_v26 = vpack.c.bf16 %v807_v5, %v805_v56 }
 0x109   : > { %872 = vst [vmem:[%s1947_s21 + $0x98] sm:$0xff] %v808_v10  ;;  %v809_v19 = vmax.f32 %v745_v11, 0.0  ;;  %v746_v20 = vadd.f32 %v1939_v22, %v670_v3  ;;  %v671_v21 = vmul.f32 %v1925_v13, %v533_v15  ;;  %v535_v23 = vadd.f32 %v534_v16, %v1927_v14 }
 0x10a   : > { %v538_v24 = vpop.f32.mrf.mxu0  ;;  %v926_v25 = vpack.c.bf16 %v808_v10, %v806_v63 }
 0x10b   : > { %873 = vst [vmem:[%s1947_s21 + $0xa0] sm:$0xff] %v809_v19  ;;  %v810_v27 = vmax.f32 %v746_v20, 0.0  ;;  %v747_v28 = vadd.f32 %v1931_v17, %v671_v21  ;;  %v672_v29 = vmul.f32 %v1933_v18, %v535_v23  ;;  %v539_v30 = vadd.f32 %v538_v24, %v1920_v12 }
 0x10c   : > { %1148 = vmatprep.mubr.bf16.mxu1 %v926_v25  ;;  %v540_v31 = vpop.f32.mrf.mxu0 }
 0x10d   : > { %874 = vst [vmem:[%s1947_s21 + $0xa8] sm:$0xff] %v810_v27  ;;  %v811_v32 = vmax.f32 %v747_v28, 0.0  ;;  %v748_v33 = vadd.f32 %v1939_v22, %v672_v29  ;;  %v673_v34 = vmul.f32 %v1925_v13, %v539_v30  ;;  %v541_v35 = vadd.f32 %v540_v31, %v1927_v14  ;;  %1149 = vmatmul.mubr.bf16.gmra.mxu1 %v925_v26 }
 0x10e   : > { %v542_v36 = vpop.f32.mrf.mxu0 }
 0x10f   : > { %875 = vst [vmem:[%s1947_s21 + $0xb0] sm:$0xff] %v811_v32  ;;  %v812_v37 = vmax.f32 %v748_v33, 0.0  ;;  %v749_v38 = vadd.f32 %v1931_v17, %v673_v34  ;;  %v674_v39 = vmul.f32 %v1933_v18, %v541_v35  ;;  %v543_v40 = vadd.f32 %v542_v36, %v1920_v12 }
 0x110   : > { %v544_v41 = vpop.f32.mrf.mxu0  ;;  %v927_v48 = vpack.c.bf16 %v811_v32, %v809_v19 }
 0x111   : > { %876 = vst [vmem:[%s1947_s21 + $0xb8] sm:$0xff] %v812_v37  ;;  %v813_v42 = vmax.f32 %v749_v38, 0.0  ;;  %v750_v43 = vadd.f32 %v1939_v22, %v674_v39  ;;  %v675_v44 = vmul.f32 %v1925_v13, %v543_v40  ;;  %v545_v45 = vadd.f32 %v544_v41, %v1927_v14 }
 0x112   : > { %v548_v46 = vpop.f32.mrf.mxu0  ;;  %v928_v47 = vpack.c.bf16 %v812_v37, %v810_v27 }
 0x113   : > { %877 = vst [vmem:[%s1947_s21 + $0xc0] sm:$0xff] %v813_v42  ;;  %v814_v49 = vmax.f32 %v750_v43, 0.0  ;;  %v751_v50 = vadd.f32 %v1931_v17, %v675_v44  ;;  %v676_v51 = vmul.f32 %v1933_v18, %v545_v45  ;;  %v549_v52 = vadd.f32 %v548_v46, %v1920_v12 }
 0x114   : > { %1156 = vmatprep.mubr.bf16.mxu1 %v928_v47  ;;  %v550_v53 = vpop.f32.mrf.mxu0 }
 0x115   : > { %878 = vst [vmem:[%s1947_s21 + $0xc8] sm:$0xff] %v814_v49  ;;  %v815_v54 = vmax.f32 %v751_v50, 0.0  ;;  %v752_v55 = vadd.f32 %v1939_v22, %v676_v51  ;;  %v677_v56 = vmul.f32 %v1925_v13, %v549_v52  ;;  %v551_v57 = vadd.f32 %v550_v53, %v1927_v14  ;;  %1157 = vmatmul.mubr.bf16.gmra.mxu1 %v927_v48 }
 0x116   : > { %v552_v58 = vpop.f32.mrf.mxu0 }
 0x117   : > { %879 = vst [vmem:[%s1947_s21 + $0xd0] sm:$0xff] %v815_v54  ;;  %v816_v59 = vmax.f32 %v752_v55, 0.0  ;;  %v753_v60 = vadd.f32 %v1931_v17, %v677_v56  ;;  %v678_v61 = vmul.f32 %v1933_v18, %v551_v57  ;;  %v553_v62 = vadd.f32 %v552_v58, %v1920_v12 }
 0x118   : > { %v554_v63 = vpop.f32.mrf.mxu0  ;;  %v929_v7 = vpack.c.bf16 %v815_v54, %v813_v42 }
 0x119   : > { %880 = vst [vmem:[%s1947_s21 + $0xd8] sm:$0xff] %v816_v59  ;;  %v817_v0 = vmax.f32 %v753_v60, 0.0  ;;  %v754_v1 = vadd.f32 %v1939_v22, %v678_v61  ;;  %v679_v2 = vmul.f32 %v1925_v13, %v553_v62  ;;  %v555_v4 = vadd.f32 %v554_v63, %v1927_v14 }
 0x11a   : > { %v558_v5 = vpop.f32.mrf.mxu0  ;;  %v930_v6 = vpack.c.bf16 %v816_v59, %v814_v49 }
 0x11b   : > { %881 = vst [vmem:[%s1947_s21 + $0xe0] sm:$0xff] %v817_v0  ;;  %v818_v8 = vmax.f32 %v754_v1, 0.0  ;;  %v755_v9 = vadd.f32 %v1931_v17, %v679_v2  ;;  %v680_v10 = vmul.f32 %v1933_v18, %v555_v4  ;;  %v559_v11 = vadd.f32 %v558_v5, %v1920_v12 }
 0x11c   : > { %1164 = vmatprep.mubr.bf16.mxu1 %v930_v6  ;;  %v560_v3 = vpop.f32.mrf.mxu0 }
 0x11d   : > { %882 = vst [vmem:[%s1947_s21 + $0xe8] sm:$0xff] %v818_v8  ;;  %v819_v15 = vmax.f32 %v755_v9, 0.0  ;;  %v756_v16 = vadd.f32 %v1939_v22, %v680_v10  ;;  %v681_v19 = vmul.f32 %v1925_v13, %v559_v11  ;;  %v561_v20 = vadd.f32 %v560_v3, %v1927_v14  ;;  %1165 = vmatmul.mubr.bf16.gmra.mxu1 %v929_v7 }
 0x11e   : > { %v562_v21 = vpop.f32.mrf.mxu0 }
 0x11f   : > { %883 = vst [vmem:[%s1947_s21 + $0xf0] sm:$0xff] %v819_v15  ;;  %v820_v23 = vmax.f32 %v756_v16, 0.0  ;;  %v757_v24 = vadd.f32 %v1931_v17, %v681_v19  ;;  %v682_v25 = vmul.f32 %v1933_v18, %v561_v20  ;;  %v563_v26 = vadd.f32 %v562_v21, %v1920_v12 }
 0x120   : > { %v564_v27 = vpop.f32.mrf.mxu0  ;;  %v931_v34 = vpack.c.bf16 %v819_v15, %v817_v0 }
 0x121   : > { %884 = vst [vmem:[%s1947_s21 + $0xf8] sm:$0xff] %v820_v23  ;;  %v821_v28 = vmax.f32 %v757_v24, 0.0  ;;  %v758_v29 = vadd.f32 %v1939_v22, %v682_v25  ;;  %v683_v30 = vmul.f32 %v1925_v13, %v563_v26  ;;  %v565_v31 = vadd.f32 %v564_v27, %v1927_v14 }
 0x122   : > { %v568_v32 = vpop.f32.mrf.mxu0  ;;  %v932_v33 = vpack.c.bf16 %v820_v23, %v818_v8 }
 0x123   : > { %885 = vst [vmem:[%s1947_s21 + $0x100] sm:$0xff] %v821_v28  ;;  %v822_v35 = vmax.f32 %v758_v29, 0.0  ;;  %v759_v36 = vadd.f32 %v1931_v17, %v683_v30  ;;  %v684_v37 = vmul.f32 %v1933_v18, %v565_v31  ;;  %v569_v38 = vadd.f32 %v568_v32, %v1920_v12 }
 0x124   : > { %1172 = vmatprep.mubr.bf16.mxu1 %v932_v33  ;;  %v570_v39 = vpop.f32.mrf.mxu0 }
 0x125   : > { %886 = vst [vmem:[%s1947_s21 + $0x108] sm:$0xff] %v822_v35  ;;  %v823_v40 = vmax.f32 %v759_v36, 0.0  ;;  %v760_v41 = vadd.f32 %v1939_v22, %v684_v37  ;;  %v685_v42 = vmul.f32 %v1925_v13, %v569_v38  ;;  %v571_v43 = vadd.f32 %v570_v39, %v1927_v14  ;;  %1173 = vmatmul.mubr.bf16.gmra.mxu1 %v931_v34 }
 0x126   : > { %v572_v44 = vpop.f32.mrf.mxu0 }
 0x127   : > { %887 = vst [vmem:[%s1947_s21 + $0x110] sm:$0xff] %v823_v40  ;;  %v824_v45 = vmax.f32 %v760_v41, 0.0  ;;  %v761_v46 = vadd.f32 %v1931_v17, %v685_v42  ;;  %v686_v47 = vmul.f32 %v1933_v18, %v571_v43  ;;  %v573_v48 = vadd.f32 %v572_v44, %v1920_v12 }
 0x128   : > { %v574_v49 = vpop.f32.mrf.mxu0  ;;  %v933_v56 = vpack.c.bf16 %v823_v40, %v821_v28 }
 0x129   : > { %888 = vst [vmem:[%s1947_s21 + $0x118] sm:$0xff] %v824_v45  ;;  %v825_v50 = vmax.f32 %v761_v46, 0.0  ;;  %v762_v51 = vadd.f32 %v1939_v22, %v686_v47  ;;  %v687_v52 = vmul.f32 %v1925_v13, %v573_v48  ;;  %v575_v53 = vadd.f32 %v574_v49, %v1927_v14 }
 0x12a   : > { %v578_v54 = vpop.f32.mrf.mxu0  ;;  %v934_v55 = vpack.c.bf16 %v824_v45, %v822_v35 }
 0x12b   : > { %889 = vst [vmem:[%s1947_s21 + $0x120] sm:$0xff] %v825_v50  ;;  %v826_v57 = vmax.f32 %v762_v51, 0.0  ;;  %v763_v58 = vadd.f32 %v1931_v17, %v687_v52  ;;  %v688_v59 = vmul.f32 %v1933_v18, %v575_v53  ;;  %v579_v60 = vadd.f32 %v578_v54, %v1920_v12 }
 0x12c   : > { %1180 = vmatprep.mubr.bf16.mxu1 %v934_v55  ;;  %v580_v61 = vpop.f32.mrf.mxu0 }
 0x12d   : > { %890 = vst [vmem:[%s1947_s21 + $0x128] sm:$0xff] %v826_v57  ;;  %v827_v62 = vmax.f32 %v763_v58, 0.0  ;;  %v764_v63 = vadd.f32 %v1939_v22, %v688_v59  ;;  %v689_v0 = vmul.f32 %v1925_v13, %v579_v60  ;;  %v581_v1 = vadd.f32 %v580_v61, %v1927_v14  ;;  %1181 = vmatmul.mubr.bf16.gmra.mxu1 %v933_v56 }
 0x12e   : > { %v582_v2 = vpop.f32.mrf.mxu0 }
 0x12f   : > { %891 = vst [vmem:[%s1947_s21 + $0x130] sm:$0xff] %v827_v62  ;;  %v828_v4 = vmax.f32 %v764_v63, 0.0  ;;  %v765_v5 = vadd.f32 %v1931_v17, %v689_v0  ;;  %v690_v6 = vmul.f32 %v1933_v18, %v581_v1  ;;  %v583_v7 = vadd.f32 %v582_v2, %v1920_v12 }
 0x130   : > { %v584_v8 = vpop.f32.mrf.mxu0  ;;  %v935_v19 = vpack.c.bf16 %v827_v62, %v825_v50 }
 0x131   : > { %892 = vst [vmem:[%s1947_s21 + $0x138] sm:$0xff] %v828_v4  ;;  %v829_v9 = vmax.f32 %v765_v5, 0.0  ;;  %v766_v10 = vadd.f32 %v1939_v22, %v690_v6  ;;  %v691_v11 = vmul.f32 %v1925_v13, %v583_v7  ;;  %v585_v3 = vadd.f32 %v584_v8, %v1927_v14 }
 0x132   : > { %v588_v15 = vpop.f32.mrf.mxu0  ;;  %v936_v16 = vpack.c.bf16 %v828_v4, %v826_v57 }
 0x133   : > { %893 = vst [vmem:[%s1947_s21 + $0x140] sm:$0xff] %v829_v9  ;;  %v830_v20 = vmax.f32 %v766_v10, 0.0  ;;  %v767_v21 = vadd.f32 %v1931_v17, %v691_v11  ;;  %v692_v23 = vmul.f32 %v1933_v18, %v585_v3  ;;  %v589_v24 = vadd.f32 %v588_v15, %v1920_v12 }
 0x134   : > { %1188 = vmatprep.mubr.bf16.mxu1 %v936_v16  ;;  %v590_v25 = vpop.f32.mrf.mxu0 }
 0x135   : > { %894 = vst [vmem:[%s1947_s21 + $0x148] sm:$0xff] %v830_v20  ;;  %v831_v26 = vmax.f32 %v767_v21, 0.0  ;;  %v768_v27 = vadd.f32 %v1939_v22, %v692_v23  ;;  %v693_v28 = vmul.f32 %v1925_v13, %v589_v24  ;;  %v591_v29 = vadd.f32 %v590_v25, %v1927_v14  ;;  %1189 = vmatmul.mubr.bf16.gmra.mxu1 %v935_v19 }
 0x136   : > { %v592_v30 = vpop.f32.mrf.mxu0 }
 0x137   : > { %895 = vst [vmem:[%s1947_s21 + $0x150] sm:$0xff] %v831_v26  ;;  %v832_v31 = vmax.f32 %v768_v27, 0.0  ;;  %v769_v32 = vadd.f32 %v1931_v17, %v693_v28  ;;  %v694_v33 = vmul.f32 %v1933_v18, %v591_v29  ;;  %v593_v34 = vadd.f32 %v592_v30, %v1920_v12 }
 0x138   : > { %v594_v35 = vpop.f32.mrf.mxu0  ;;  %v937_v42 = vpack.c.bf16 %v831_v26, %v829_v9 }
 0x139   : > { %896 = vst [vmem:[%s1947_s21 + $0x158] sm:$0xff] %v832_v31  ;;  %v833_v36 = vmax.f32 %v769_v32, 0.0  ;;  %v770_v37 = vadd.f32 %v1939_v22, %v694_v33  ;;  %v695_v38 = vmul.f32 %v1925_v13, %v593_v34  ;;  %v595_v39 = vadd.f32 %v594_v35, %v1927_v14 }
 0x13a   : > { %v598_v40 = vpop.f32.mrf.mxu0  ;;  %v938_v41 = vpack.c.bf16 %v832_v31, %v830_v20 }
 0x13b   : > { %897 = vst [vmem:[%s1947_s21 + $0x160] sm:$0xff] %v833_v36  ;;  %v834_v43 = vmax.f32 %v770_v37, 0.0  ;;  %v771_v44 = vadd.f32 %v1931_v17, %v695_v38  ;;  %v696_v45 = vmul.f32 %v1933_v18, %v595_v39  ;;  %v599_v46 = vadd.f32 %v598_v40, %v1920_v12 }
 0x13c   : > { %1196 = vmatprep.mubr.bf16.mxu1 %v938_v41  ;;  %v600_v47 = vpop.f32.mrf.mxu0 }
 0x13d   : > { %898 = vst [vmem:[%s1947_s21 + $0x168] sm:$0xff] %v834_v43  ;;  %v835_v48 = vmax.f32 %v771_v44, 0.0  ;;  %v772_v49 = vadd.f32 %v1939_v22, %v696_v45  ;;  %v697_v50 = vmul.f32 %v1925_v13, %v599_v46  ;;  %v601_v51 = vadd.f32 %v600_v47, %v1927_v14  ;;  %1197 = vmatmul.mubr.bf16.gmra.mxu1 %v937_v42 }
 0x13e   : > { %v602_v52 = vpop.f32.mrf.mxu0 }
 0x13f   : > { %899 = vst [vmem:[%s1947_s21 + $0x170] sm:$0xff] %v835_v48  ;;  %v836_v53 = vmax.f32 %v772_v49, 0.0  ;;  %v773_v54 = vadd.f32 %v1931_v17, %v697_v50  ;;  %v698_v55 = vmul.f32 %v1933_v18, %v601_v51  ;;  %v603_v56 = vadd.f32 %v602_v52, %v1920_v12 }
 0x140   : > { %v604_v57 = vpop.f32.mrf.mxu0  ;;  %v939_v0 = vpack.c.bf16 %v835_v48, %v833_v36 }
 0x141   : > { %900 = vst [vmem:[%s1947_s21 + $0x178] sm:$0xff] %v836_v53  ;;  %v837_v58 = vmax.f32 %v773_v54, 0.0  ;;  %v774_v59 = vadd.f32 %v1939_v22, %v698_v55  ;;  %v699_v60 = vmul.f32 %v1925_v13, %v603_v56  ;;  %v605_v61 = vadd.f32 %v604_v57, %v1927_v14 }
 0x142   : > { %v608_v62 = vpop.f32.mrf.mxu0  ;;  %v940_v63 = vpack.c.bf16 %v836_v53, %v834_v43 }
 0x143   : > { %901 = vst [vmem:[%s1947_s21 + $0x180] sm:$0xff] %v837_v58  ;;  %v838_v1 = vmax.f32 %v774_v59, 0.0  ;;  %v775_v2 = vadd.f32 %v1931_v17, %v699_v60  ;;  %v700_v4 = vmul.f32 %v1933_v18, %v605_v61  ;;  %v609_v5 = vadd.f32 %v608_v62, %v1920_v12 }
 0x144   : > { %1204 = vmatprep.mubr.bf16.mxu1 %v940_v63  ;;  %v610_v6 = vpop.f32.mrf.mxu0 }
 0x145   : > { %902 = vst [vmem:[%s1947_s21 + $0x188] sm:$0xff] %v838_v1  ;;  %v839_v7 = vmax.f32 %v775_v2, 0.0  ;;  %v776_v8 = vadd.f32 %v1939_v22, %v700_v4  ;;  %v701_v9 = vmul.f32 %v1925_v13, %v609_v5  ;;  %v611_v10 = vadd.f32 %v610_v6, %v1927_v14  ;;  %1205 = vmatmul.mubr.bf16.gmra.mxu1 %v939_v0 }
 0x146   : > { %v612_v11 = vpop.f32.mrf.mxu0 }
 0x147   : > { %903 = vst [vmem:[%s1947_s21 + $0x190] sm:$0xff] %v839_v7  ;;  %v840_v3 = vmax.f32 %v776_v8, 0.0  ;;  %v777_v15 = vadd.f32 %v1931_v17, %v701_v9  ;;  %v702_v16 = vmul.f32 %v1933_v18, %v611_v10  ;;  %v613_v19 = vadd.f32 %v612_v11, %v1920_v12 }
 0x148   : > { %v614_v20 = vpop.f32.mrf.mxu0  ;;  %v941_v28 = vpack.c.bf16 %v839_v7, %v837_v58 }
 0x149   : > { %904 = vst [vmem:[%s1947_s21 + $0x198] sm:$0xff] %v840_v3  ;;  %v841_v21 = vmax.f32 %v777_v15, 0.0  ;;  %v778_v23 = vadd.f32 %v1939_v22, %v702_v16  ;;  %v703_v24 = vmul.f32 %v1925_v13, %v613_v19  ;;  %v615_v25 = vadd.f32 %v614_v20, %v1927_v14 }
 0x14a   : > { %v618_v26 = vpop.f32.mrf.mxu0  ;;  %v942_v27 = vpack.c.bf16 %v840_v3, %v838_v1 }
 0x14b   : > { %905 = vst [vmem:[%s1947_s21 + $0x1a0] sm:$0xff] %v841_v21  ;;  %v842_v29 = vmax.f32 %v778_v23, 0.0  ;;  %v779_v30 = vadd.f32 %v1931_v17, %v703_v24  ;;  %v704_v31 = vmul.f32 %v1933_v18, %v615_v25  ;;  %v619_v32 = vadd.f32 %v618_v26, %v1920_v12 }
 0x14c   : > { %1212 = vmatprep.mubr.bf16.mxu1 %v942_v27  ;;  %v620_v33 = vpop.f32.mrf.mxu0 }
 0x14d   : > { %906 = vst [vmem:[%s1947_s21 + $0x1a8] sm:$0xff] %v842_v29  ;;  %v843_v34 = vmax.f32 %v779_v30, 0.0  ;;  %v780_v35 = vadd.f32 %v1939_v22, %v704_v31  ;;  %v705_v36 = vmul.f32 %v1925_v13, %v619_v32  ;;  %v621_v37 = vadd.f32 %v620_v33, %v1927_v14  ;;  %1213 = vmatmul.mubr.bf16.gmra.mxu1 %v941_v28 }
 0x14e   : > { %v622_v38 = vpop.f32.mrf.mxu0 }
 0x14f   : > { %907 = vst [vmem:[%s1947_s21 + $0x1b0] sm:$0xff] %v843_v34  ;;  %v844_v39 = vmax.f32 %v780_v35, 0.0  ;;  %v781_v40 = vadd.f32 %v1931_v17, %v705_v36  ;;  %v706_v41 = vmul.f32 %v1933_v18, %v621_v37  ;;  %v623_v42 = vadd.f32 %v622_v38, %v1920_v12 }
 0x150   : > { %v624_v43 = vpop.f32.mrf.mxu0  ;;  %v943_v50 = vpack.c.bf16 %v843_v34, %v841_v21 }
 0x151   : > { %908 = vst [vmem:[%s1947_s21 + $0x1b8] sm:$0xff] %v844_v39  ;;  %v845_v44 = vmax.f32 %v781_v40, 0.0  ;;  %v782_v45 = vadd.f32 %v1939_v22, %v706_v41  ;;  %v707_v46 = vmul.f32 %v1925_v13, %v623_v42  ;;  %v625_v47 = vadd.f32 %v624_v43, %v1927_v14 }
 0x152   : > { %v628_v48 = vpop.f32.mrf.mxu0  ;;  %v944_v49 = vpack.c.bf16 %v844_v39, %v842_v29 }
 0x153   : > { %909 = vst [vmem:[%s1947_s21 + $0x1c0] sm:$0xff] %v845_v44  ;;  %v846_v51 = vmax.f32 %v782_v45, 0.0  ;;  %v783_v52 = vadd.f32 %v1931_v17, %v707_v46  ;;  %v708_v53 = vmul.f32 %v1933_v18, %v625_v47  ;;  %v629_v54 = vadd.f32 %v628_v48, %v1920_v12 }
 0x154   : > { %1220 = vmatprep.mubr.bf16.mxu1 %v944_v49  ;;  %v630_v55 = vpop.f32.mrf.mxu0 }
 0x155   : > { %910 = vst [vmem:[%s1947_s21 + $0x1c8] sm:$0xff] %v846_v51  ;;  %v847_v56 = vmax.f32 %v783_v52, 0.0  ;;  %v784_v57 = vadd.f32 %v1939_v22, %v708_v53  ;;  %v709_v58 = vmul.f32 %v1925_v13, %v629_v54  ;;  %v631_v59 = vadd.f32 %v630_v55, %v1927_v14  ;;  %1221 = vmatmul.mubr.bf16.gmra.mxu1 %v943_v50 }
 0x156   : > { %v632_v60 = vpop.f32.mrf.mxu0 }
 0x157   : > { %911 = vst [vmem:[%s1947_s21 + $0x1d0] sm:$0xff] %v847_v56  ;;  %v848_v61 = vmax.f32 %v784_v57, 0.0  ;;  %v785_v62 = vadd.f32 %v1931_v17, %v709_v58  ;;  %v710_v63 = vmul.f32 %v1933_v18, %v631_v59  ;;  %v633_v0 = vadd.f32 %v632_v60, %v1920_v12 }
 0x158   : > { %v634_v1 = vpop.f32.mrf.mxu0  ;;  %v945_v12 = vpack.c.bf16 %v847_v56, %v845_v44 }
 0x159   : > { %912 = vst [vmem:[%s1947_s21 + $0x1d8] sm:$0xff] %v848_v61  ;;  %v849_v2 = vmax.f32 %v785_v62, 0.0  ;;  %v786_v4 = vadd.f32 %v1939_v22, %v710_v63  ;;  %v711_v5 = vmul.f32 %v1925_v13, %v633_v0  ;;  %v635_v6 = vadd.f32 %v634_v1, %v1927_v14 }
 0x15a   : > { %v946_v7 = vpack.c.bf16 %v848_v61, %v846_v51 }
 0x15b   : > { %913 = vst [vmem:[%s1947_s21 + $0x1e0] sm:$0xff] %v849_v2  ;;  %v850_v8 = vmax.f32 %v786_v4, 0.0  ;;  %v787_v9 = vadd.f32 %v1931_v17, %v711_v5  ;;  %v712_v10 = vmul.f32 %v1933_v18, %v635_v6  ;;  %v2206_v18 = vld [vmem:[%s2329_s6] ss:$0 sm:$0xff] }
 0x15c   : > { %1228 = vmatprep.mubr.bf16.mxu1 %v946_v7 }
 0x15d   : > { %914 = vst [vmem:[%s1947_s21 + $0x1e8] sm:$0xff] %v850_v8  ;;  %v851_v11 = vmax.f32 %v787_v9, 0.0  ;;  %v788_v3 = vadd.f32 %v1939_v22, %v712_v10  ;;  %1229 = vmatmul.mubr.bf16.gmra.mxu1 %v945_v12 }
 0x15f   : > { %915 = vst [vmem:[%s1947_s21 + $0x1f0] sm:$0xff] %v851_v11  ;;  %v852_v13 = vmax.f32 %v788_v3, 0.0  ;;  %v947_v15 = vpack.c.bf16 %v851_v11, %v849_v2 }
 0x161   : > { %916 = vst [vmem:[%s1947_s21 + $0x1f8] sm:$0xff] %v852_v13  ;;  %v948_v14 = vpack.c.bf16 %v852_v13, %v850_v8  ;;  %s1692_s21 = smov [#allocation2]  }
 0x162   : > { %s1633_s22 = sshll.u32 %s1692_s21, 4  ;;  %s1634_s22 = int_to_ptr.vmem [resolvable:$false] %s1633_s22 }
 0x163   : > { %1236 = vmatprep.mubr.bf16.mxu1 %v948_v14  ;;  %s1635_s23 = scalar_lea.vmem %s1634_s22, 16384  ;;  %p1636_p0 = scmp.lt.s32.totalorder %s2215_s17, %s1634_s22 }
 0x164   : > { %p1637_p1 = scmp.lt.s32.totalorder %s1635_s23, %s1629_s9 }
 0x165   : > { %1237 = vmatmul.mubr.bf16.gmra.mxu1 %v947_v15 }
 0x166   : > { %p1638_p2 = por %p1637_p1, %p1636_p0 }
 0x168   : > { %p1639_p3 = pnand %p1638_p2, %p1632_p13 }
 0x1ac   : > { %v1457_v17 = vpop.f32.mrf.mxu0 }
 0x1ae   : > { %v1458_v22 = vpop.f32.mrf.mxu0 }
 0x1af   : > { %v1459_v16 = vadd.f32 %v1458_v22, %v1457_v17 }
 0x1b0   : > { %v1460_v19 = vpop.f32.mrf.mxu0 }
 0x1b1   : > { %v1119_v20 = vadd.f32 %v1459_v16, %v2206_v18 }
 0x1b2   : > { %v1461_v21 = vpop.f32.mrf.mxu0 }
 0x1b3   : > { %1642 = shalt.err (!%p1639_p3)
}
 0x1b4   : > { %s1643_s25 = scalar_lea.hbm %s2213_s18, 8192  ;;  %s1647_s13 = scalar_lea.hbm %s2330_s7, 16384 }
 0x1b5   : > { %p1644_p4 = scmp.ne.s32.totalorder %s2213_s18, %s1643_s25  ;;  %p1648_p9 = scmp.lt.s32.totalorder %s2213_s18, %s2330_s7 }
 0x1b6   : > { %p1649_p10 = scmp.lt.s32.totalorder %s1647_s13, %s1643_s25 }
 0x1b7   : > { %p1645_p7 = pnand %p1644_p4, %p1778_p5 }
 0x1b8   : > { %p1650_p11 = por %p1649_p10, %p1648_p9 }
 0x1b9   : > { %p1646_p8 = pneg %p1645_p7 }
 0x1bb   : > { %p1651_p12 = pnand %p1650_p11, %p1646_p8 }
 0x1bd   : > { %1654 = shalt.err (!%p1651_p12)
}
 0x1be   : > { %s1693_s9 = smov 256   ;;  %s1694_s21 = smov 16   ;;  %1245 = vst [vmem:[%s2201_s24] sm:$0xff] %v1119_v20  ;;  %v1462_v23 = vadd.f32 %v1461_v21, %v1460_v19  ;;  %v1463_v25 = vpop.f32.mrf.mxu1 }
 0x1bf   : > { %1569 = dma.vmem_to_hbm [thread:$0]  (%p1778_p5), %s2215_s17, 8192, %s2213_s18, %s2220_s26, %s1693_s9, %s1693_s9, %s1694_s21  }
 0x1c0   : > { %v1122_v24 = vadd.f32 %v1462_v23, %v2206_v18  ;;  %v1464_v26 = vpop.f32.mrf.mxu1 }
 0x1c1   : > { %v1465_v27 = vadd.f32 %v1464_v26, %v1463_v25 }
 0x1c2   : > { %1246 = vst [vmem:[%s2201_s24 + $0x8] sm:$0xff] %v1122_v24  ;;  %v1466_v28 = vpop.f32.mrf.mxu1 }
 0x1c3   : > { %v1127_v29 = vadd.f32 %v1465_v27, %v2206_v18 }
 0x1c4   : > { %v1467_v30 = vpop.f32.mrf.mxu1 }
 0x1c5   : > { %1247 = vst [vmem:[%s2201_s24 + $0x10] sm:$0xff] %v1127_v29  ;;  %v1468_v31 = vadd.f32 %v1467_v30, %v1466_v28 }
 0x1c6   : > { %v1469_v32 = vpop.f32.mrf.mxu1 }
 0x1c7   : > { %v1130_v33 = vadd.f32 %v1468_v31, %v2206_v18 }
 0x1c8   : > { %v1470_v34 = vpop.f32.mrf.mxu1 }
 0x1c9   : > { %1248 = vst [vmem:[%s2201_s24 + $0x18] sm:$0xff] %v1130_v33  ;;  %v1471_v35 = vadd.f32 %v1470_v34, %v1469_v32 }
 0x1ca   : > { %v1472_v36 = vpop.f32.mrf.mxu1 }
 0x1cb   : > { %v1135_v37 = vadd.f32 %v1471_v35, %v2206_v18 }
 0x1cc   : > { %v1473_v38 = vpop.f32.mrf.mxu1 }
 0x1cd   : > { %1249 = vst [vmem:[%s2201_s24 + $0x20] sm:$0xff] %v1135_v37  ;;  %v1474_v39 = vadd.f32 %v1473_v38, %v1472_v36 }
 0x1ce   : > { %v1475_v40 = vpop.f32.mrf.mxu1 }
 0x1cf   : > { %v1138_v41 = vadd.f32 %v1474_v39, %v2206_v18 }
 0x1d0   : > { %v1476_v42 = vpop.f32.mrf.mxu1 }
 0x1d1   : > { %1250 = vst [vmem:[%s2201_s24 + $0x28] sm:$0xff] %v1138_v41  ;;  %v1477_v43 = vadd.f32 %v1476_v42, %v1475_v40 }
 0x1d2   : > { %v1478_v44 = vpop.f32.mrf.mxu1 }
 0x1d3   : > { %v1143_v45 = vadd.f32 %v1477_v43, %v2206_v18 }
 0x1d4   : > { %v1479_v46 = vpop.f32.mrf.mxu1 }
 0x1d5   : > { %1251 = vst [vmem:[%s2201_s24 + $0x30] sm:$0xff] %v1143_v45  ;;  %v1480_v47 = vadd.f32 %v1479_v46, %v1478_v44 }
 0x1d6   : > { %v1481_v48 = vpop.f32.mrf.mxu1 }
 0x1d7   : > { %v1146_v49 = vadd.f32 %v1480_v47, %v2206_v18 }
 0x1d8   : > { %v1482_v50 = vpop.f32.mrf.mxu1 }
 0x1d9   : > { %1252 = vst [vmem:[%s2201_s24 + $0x38] sm:$0xff] %v1146_v49  ;;  %v1483_v51 = vadd.f32 %v1482_v50, %v1481_v48 }
 0x1da   : > { %v1484_v52 = vpop.f32.mrf.mxu1 }
 0x1db   : > { %v1151_v53 = vadd.f32 %v1483_v51, %v2206_v18 }
 0x1dc   : > { %v1485_v54 = vpop.f32.mrf.mxu1 }
 0x1dd   : > { %1253 = vst [vmem:[%s2201_s24 + $0x40] sm:$0xff] %v1151_v53  ;;  %v1486_v55 = vadd.f32 %v1485_v54, %v1484_v52 }
 0x1de   : > { %v1487_v56 = vpop.f32.mrf.mxu1 }
 0x1df   : > { %v1154_v57 = vadd.f32 %v1486_v55, %v2206_v18 }
 0x1e0   : > { %v1488_v58 = vpop.f32.mrf.mxu1 }
 0x1e1   : > { %1254 = vst [vmem:[%s2201_s24 + $0x48] sm:$0xff] %v1154_v57  ;;  %v1489_v59 = vadd.f32 %v1488_v58, %v1487_v56 }
 0x1e2   : > { %v1490_v60 = vpop.f32.mrf.mxu1 }
 0x1e3   : > { %v1159_v61 = vadd.f32 %v1489_v59, %v2206_v18 }
 0x1e4   : > { %v1491_v62 = vpop.f32.mrf.mxu1 }
 0x1e5   : > { %1255 = vst [vmem:[%s2201_s24 + $0x50] sm:$0xff] %v1159_v61  ;;  %v1492_v63 = vadd.f32 %v1491_v62, %v1490_v60 }
 0x1e6   : > { %v1493_v0 = vpop.f32.mrf.mxu1 }
 0x1e7   : > { %v1162_v1 = vadd.f32 %v1492_v63, %v2206_v18 }
 0x1e8   : > { %v1494_v2 = vpop.f32.mrf.mxu1 }
 0x1e9   : > { %1256 = vst [vmem:[%s2201_s24 + $0x58] sm:$0xff] %v1162_v1  ;;  %v1495_v4 = vadd.f32 %v1494_v2, %v1493_v0 }
 0x1ea   : > { %v1496_v5 = vpop.f32.mrf.mxu1 }
 0x1eb   : > { %v1167_v6 = vadd.f32 %v1495_v4, %v2206_v18 }
 0x1ec   : > { %v1497_v7 = vpop.f32.mrf.mxu1 }
 0x1ed   : > { %1257 = vst [vmem:[%s2201_s24 + $0x60] sm:$0xff] %v1167_v6  ;;  %v1498_v8 = vadd.f32 %v1497_v7, %v1496_v5 }
 0x1ee   : > { %v1499_v9 = vpop.f32.mrf.mxu1 }
 0x1ef   : > { %v1170_v10 = vadd.f32 %v1498_v8, %v2206_v18 }
 0x1f0   : > { %v1500_v12 = vpop.f32.mrf.mxu1 }
 0x1f1   : > { %1258 = vst [vmem:[%s2201_s24 + $0x68] sm:$0xff] %v1170_v10  ;;  %v1501_v11 = vadd.f32 %v1500_v12, %v1499_v9 }
 0x1f2   : > { %v1502_v3 = vpop.f32.mrf.mxu1 }
 0x1f3   : > { %v1175_v13 = vadd.f32 %v1501_v11, %v2206_v18 }
 0x1f4   : > { %v1503_v14 = vpop.f32.mrf.mxu1 }
 0x1f5   : > { %1259 = vst [vmem:[%s2201_s24 + $0x70] sm:$0xff] %v1175_v13  ;;  %v1504_v15 = vadd.f32 %v1503_v14, %v1502_v3 }
 0x1f6   : > { %v1505_v17 = vpop.f32.mrf.mxu1 }
 0x1f7   : > { %v1178_v22 = vadd.f32 %v1504_v15, %v2206_v18 }
 0x1f8   : > { %v1506_v16 = vpop.f32.mrf.mxu1 }
 0x1f9   : > { %1260 = vst [vmem:[%s2201_s24 + $0x78] sm:$0xff] %v1178_v22  ;;  %v1507_v19 = vadd.f32 %v1506_v16, %v1505_v17 }
 0x1fa   : > { %v1508_v20 = vpop.f32.mrf.mxu1 }
 0x1fb   : > { %v1183_v21 = vadd.f32 %v1507_v19, %v2206_v18 }
 0x1fc   : > { %v1509_v23 = vpop.f32.mrf.mxu1 }
 0x1fd   : > { %1261 = vst [vmem:[%s2201_s24 + $0x80] sm:$0xff] %v1183_v21  ;;  %v1510_v24 = vadd.f32 %v1509_v23, %v1508_v20 }
 0x1fe   : > { %v1511_v25 = vpop.f32.mrf.mxu1 }
 0x1ff   : > { %v1186_v26 = vadd.f32 %v1510_v24, %v2206_v18 }
 0x200   : > { %v1512_v27 = vpop.f32.mrf.mxu1 }
 0x201   : > { %1262 = vst [vmem:[%s2201_s24 + $0x88] sm:$0xff] %v1186_v26  ;;  %v1513_v28 = vadd.f32 %v1512_v27, %v1511_v25 }
 0x202   : > { %v1514_v29 = vpop.f32.mrf.mxu1 }
 0x203   : > { %v1191_v30 = vadd.f32 %v1513_v28, %v2206_v18 }
 0x204   : > { %v1515_v31 = vpop.f32.mrf.mxu1 }
 0x205   : > { %1263 = vst [vmem:[%s2201_s24 + $0x90] sm:$0xff] %v1191_v30  ;;  %v1516_v32 = vadd.f32 %v1515_v31, %v1514_v29 }
 0x206   : > { %v1517_v33 = vpop.f32.mrf.mxu1 }
 0x207   : > { %v1194_v34 = vadd.f32 %v1516_v32, %v2206_v18 }
 0x208   : > { %v1518_v35 = vpop.f32.mrf.mxu1 }
 0x209   : > { %1264 = vst [vmem:[%s2201_s24 + $0x98] sm:$0xff] %v1194_v34  ;;  %v1519_v36 = vadd.f32 %v1518_v35, %v1517_v33 }
 0x20a   : > { %v1520_v37 = vpop.f32.mrf.mxu1 }
 0x20b   : > { %v1199_v38 = vadd.f32 %v1519_v36, %v2206_v18 }
 0x20c   : > { %v1521_v39 = vpop.f32.mrf.mxu1 }
 0x20d   : > { %1265 = vst [vmem:[%s2201_s24 + $0xa0] sm:$0xff] %v1199_v38  ;;  %v1522_v40 = vadd.f32 %v1521_v39, %v1520_v37 }
 0x20e   : > { %v1523_v41 = vpop.f32.mrf.mxu1 }
 0x20f   : > { %v1202_v42 = vadd.f32 %v1522_v40, %v2206_v18 }
 0x210   : > { %v1524_v43 = vpop.f32.mrf.mxu1 }
 0x211   : > { %1266 = vst [vmem:[%s2201_s24 + $0xa8] sm:$0xff] %v1202_v42  ;;  %v1525_v44 = vadd.f32 %v1524_v43, %v1523_v41 }
 0x212   : > { %v1526_v45 = vpop.f32.mrf.mxu1 }
 0x213   : > { %v1207_v46 = vadd.f32 %v1525_v44, %v2206_v18 }
 0x214   : > { %v1527_v47 = vpop.f32.mrf.mxu1 }
 0x215   : > { %1267 = vst [vmem:[%s2201_s24 + $0xb0] sm:$0xff] %v1207_v46  ;;  %v1528_v48 = vadd.f32 %v1527_v47, %v1526_v45 }
 0x216   : > { %v1529_v49 = vpop.f32.mrf.mxu1 }
 0x217   : > { %v1210_v50 = vadd.f32 %v1528_v48, %v2206_v18 }
 0x218   : > { %v1530_v51 = vpop.f32.mrf.mxu1 }
 0x219   : > { %1268 = vst [vmem:[%s2201_s24 + $0xb8] sm:$0xff] %v1210_v50  ;;  %v1531_v52 = vadd.f32 %v1530_v51, %v1529_v49 }
 0x21a   : > { %v1532_v53 = vpop.f32.mrf.mxu1 }
 0x21b   : > { %v1215_v54 = vadd.f32 %v1531_v52, %v2206_v18 }
 0x21c   : > { %v1533_v55 = vpop.f32.mrf.mxu1 }
 0x21d   : > { %1269 = vst [vmem:[%s2201_s24 + $0xc0] sm:$0xff] %v1215_v54  ;;  %v1534_v56 = vadd.f32 %v1533_v55, %v1532_v53 }
 0x21e   : > { %v1535_v57 = vpop.f32.mrf.mxu1 }
 0x21f   : > { %v1218_v58 = vadd.f32 %v1534_v56, %v2206_v18 }
 0x220   : > { %v1536_v59 = vpop.f32.mrf.mxu1 }
 0x221   : > { %1270 = vst [vmem:[%s2201_s24 + $0xc8] sm:$0xff] %v1218_v58  ;;  %v1537_v60 = vadd.f32 %v1536_v59, %v1535_v57 }
 0x222   : > { %v1538_v61 = vpop.f32.mrf.mxu1 }
 0x223   : > { %v1223_v62 = vadd.f32 %v1537_v60, %v2206_v18 }
 0x224   : > { %v1539_v63 = vpop.f32.mrf.mxu1 }
 0x225   : > { %1271 = vst [vmem:[%s2201_s24 + $0xd0] sm:$0xff] %v1223_v62  ;;  %v1540_v0 = vadd.f32 %v1539_v63, %v1538_v61 }
 0x226   : > { %v1541_v1 = vpop.f32.mrf.mxu1 }
 0x227   : > { %v1226_v2 = vadd.f32 %v1540_v0, %v2206_v18 }
 0x228   : > { %v1542_v4 = vpop.f32.mrf.mxu1 }
 0x229   : > { %1272 = vst [vmem:[%s2201_s24 + $0xd8] sm:$0xff] %v1226_v2  ;;  %v1543_v5 = vadd.f32 %v1542_v4, %v1541_v1 }
 0x22a   : > { %v1544_v6 = vpop.f32.mrf.mxu1 }
 0x22b   : > { %v1231_v7 = vadd.f32 %v1543_v5, %v2206_v18 }
 0x22c   : > { %v1545_v8 = vpop.f32.mrf.mxu1 }
 0x22d   : > { %1273 = vst [vmem:[%s2201_s24 + $0xe0] sm:$0xff] %v1231_v7  ;;  %v1546_v9 = vadd.f32 %v1545_v8, %v1544_v6 }
 0x22e   : > { %v1547_v10 = vpop.f32.mrf.mxu1 }
 0x22f   : > { %v1234_v12 = vadd.f32 %v1546_v9, %v2206_v18 }
 0x230   : > { %v1548_v11 = vpop.f32.mrf.mxu1 }
 0x231   : > { %1274 = vst [vmem:[%s2201_s24 + $0xe8] sm:$0xff] %v1234_v12  ;;  %v1549_v3 = vadd.f32 %v1548_v11, %v1547_v10 }
 0x232   : > { %v1550_v13 = vpop.f32.mrf.mxu1 }
 0x233   : > { %v1239_v14 = vadd.f32 %v1549_v3, %v2206_v18 }
 0x234   : > { %v1551_v15 = vpop.f32.mrf.mxu1 }
 0x235   : > { %1275 = vst [vmem:[%s2201_s24 + $0xf0] sm:$0xff] %v1239_v14  ;;  %v1552_v17 = vadd.f32 %v1551_v15, %v1550_v13 }
 0x237   : > { %v1242_v22 = vadd.f32 %v1552_v17, %v2206_v18 }
 0x239   : > { %1276 = vst [vmem:[%s2201_s24 + $0xf8] sm:$0xff] %v1242_v22 }
 0x23a PF: > { %p1575_p5 = scmp.ge.s32.totalorder %s1689_s30, 2  ;;  %s1316_s15 = sand.u32 1, %s1677_s27  }
 0x23b   : > { %s1317_s18 = scalar_lea.sflag [#allocation3], %s1316_s15 }
 0x23c   : > { %p1572_p13 = pnand %p1575_p5, %p1782_p6 }
 0x23e   : > { %p1573_p0 = pneg %p1572_p13 }
 0x240   : > { %1672 = dma.done.wait (%p1573_p0), %s1317_s18, 8192  }
 0x241   : > { %1674 = vsyncadd (%p1573_p0), %s1317_s18, 4294959104  ;;  %p19_p1 = scmp.ge.s32.totalorder %s1765_s11, 4   ;;  %s2336_s27 = smov %s1681_s28 }
 0x242   : > { %s2337_s28 = smov %s1685_s29  ;;  %s2338_s29 = smov %s1776_s14 }
 0x243   : > { %s2339_s30 = smov %s1765_s11  ;;  %21 = sbr.rel (!%p19_p1) target bundleno = 3 (0x3), region = 95 }
 0x248   :  { %1330 = vsyncpa [#allocation3], 1 }
 0x249   :  { %1332 = vsyncpa [#allocation3 + $0x1], 1 }

</bundles_post_ra>
